<compile_context>
chip_gen: v5e
topology: v5e:2x2
jax: 0.10.0
libtpu: 0.0.40
codegen_flags: <defaults>
</compile_context>

<pallas_src>
import functools
import math

import jax
import jax.numpy as jnp
from jax.experimental import pallas as pl
from jax.experimental.pallas import tpu as pltpu

DROPOUT_P = 0.1


def _attn_kernel(q_ref, k_ref, v_ref, mask_ref, bits_ref, o_ref, *,
                 keep_threshold, drop_scale):
    # Block views: q (1,H,TQ,D), k/v (1,H,S,D), mask (1,1,TQ,S), bits (1,H,TQ,S),
    # out (1,TQ,H*D).
    H, TQ, D = q_ref.shape[1], q_ref.shape[2], q_ref.shape[3]

    # Fold the 1/sqrt(D) scale into Q (S*D elements) instead of the S*S scores.
    q = q_ref[0].astype(jnp.float32) * (1.0 / math.sqrt(D))     # (H, TQ, D)
    k = k_ref[0].astype(jnp.float32)                            # (H, S, D)
    v = v_ref[0].astype(jnp.float32)                            # (H, S, D)
    mask = mask_ref[0, 0].astype(jnp.float32)                   # (TQ, S)

    # Batched scores on the MXU; contract D of both operands (no explicit .T).
    scores = jax.lax.dot_general(
        q, k, dimension_numbers=(((2,), (2,)), ((0,), (0,))),
        preferred_element_type=jnp.float32)                     # (H, TQ, S)
    scores = scores + mask[None, :, :]

    # Numerically stable softmax over keys.
    m = jnp.max(scores, axis=-1, keepdims=True)
    p = jnp.exp(scores - m)
    denom = jnp.sum(p, axis=-1, keepdims=True)
    inv = drop_scale / denom        # dropout 1/(1-p) folded into the normalizer

    # Dropout in the integer domain: keep iff bits >= round(p * 2^32)  (prob 1-p).
    keep = bits_ref[0] >= jnp.uint32(keep_threshold)            # (H, TQ, S) bool
    attn = jnp.where(keep, p * inv, 0.0)

    # Weighted sum of values on the MXU, batched over heads.
    out = jax.lax.dot_general(
        attn, v, dimension_numbers=(((2,), (1,)), ((0,), (0,))),
        preferred_element_type=jnp.float32)                     # (H, TQ, D)

    # Store into the lane-dense (TQ, H*D) output block; head h at lanes [h*D,(h+1)*D).
    for h in range(H):  # H is a trace-time constant -> fully unrolled
        o_ref[0, :, h * D:(h + 1) * D] = out[h].astype(o_ref.dtype)


def _choose_q_block(batch, seq):
    """Pick a query tile: big (amortize per-step overhead), divisible by 8, and
    leaving >= 2 grid steps when possible so both v7x TensorCores get work."""
    tq = seq
    for cand in (256, 128):
        if seq % cand == 0:
            tq = cand
            break
    if batch * (seq // tq) < 2:
        half = tq // 2
        if half >= 8 and half % 8 == 0 and seq % half == 0:
            tq = half
    return tq


def attention_dropout(query, key, value, attn_mask, rng_key, dropout_p=DROPOUT_P):
    """softmax(Q@K^T/sqrt(D) + mask) -> dropout(p, train=True) -> @V, heads fused.

    dropout_p == 0.0 gives the eval (no-dropout) behavior.
    """
    B, H, S, D = query.shape
    assert key.shape == (B, H, S, D) and value.shape == (B, H, S, D)
    assert attn_mask.shape == (1, 1, S, S)
    assert 0.0 <= dropout_p < 1.0

    # Host-side dropout bits (uint32); thresholded inside the kernel.
    bits = jax.random.bits(rng_key, (B, H, S, S), dtype=jnp.uint32)
    keep_threshold = int(round(dropout_p * (2 ** 32)))
    drop_scale = 1.0 / (1.0 - dropout_p)

    TQ = _choose_q_block(B, S)
    n_q = S // TQ

    kernel = functools.partial(_attn_kernel, keep_threshold=keep_threshold,
                               drop_scale=drop_scale)

    # TODO(synk): for large S, switch to flash-style KV tiling (running max/sum
    # accumulators in VMEM scratch, (tq, tk) mask tiles); the full-S K/V/mask per
    # step used here only scales to moderate sequence lengths before hitting VMEM.
    out_flat = pl.pallas_call(
        kernel,
        out_shape=jax.ShapeDtypeStruct((B, S, H * D), jnp.float32),
        grid=(B, n_q),
        in_specs=[
            pl.BlockSpec((1, H, TQ, D), lambda b, qi: (b, 0, qi, 0)),   # Q
            pl.BlockSpec((1, H, S, D), lambda b, qi: (b, 0, 0, 0)),     # K
            pl.BlockSpec((1, H, S, D), lambda b, qi: (b, 0, 0, 0)),     # V
            pl.BlockSpec((1, 1, TQ, S), lambda b, qi: (0, 0, qi, 0)),   # mask
            pl.BlockSpec((1, H, TQ, S), lambda b, qi: (b, 0, qi, 0)),   # dropout bits
        ],
        out_specs=pl.BlockSpec((1, TQ, H * D), lambda b, qi: (b, qi, 0)),
        compiler_params=pltpu.CompilerParams(
            dimension_semantics=("parallel", "parallel"),
        ),
    )(query, key, value, attn_mask, bits)

    # Lane-dense (B, S, H*D) -> module layout (B, H, S, D).
    return jnp.transpose(out_flat.reshape(B, S, H, D), (0, 2, 1, 3))


if __name__ == "__main__":
    # Small shapes consistent with the module's (B, heads, seq, head_dim) layout.
    B, H, S, D = 1, 4, 128, 32

    root = jax.random.PRNGKey(0)
    kq, kk, kv, km, kdrop = jax.random.split(root, 5)
    query = jax.random.normal(kq, (B, H, S, D), dtype=jnp.float32)
    key = jax.random.normal(kk, (B, H, S, D), dtype=jnp.float32)
    value = jax.random.normal(kv, (B, H, S, D), dtype=jnp.float32)
    attn_mask = jax.random.normal(km, (1, 1, S, S), dtype=jnp.float32)

    out = attention_dropout(query, key, value, attn_mask, kdrop, dropout_p=DROPOUT_P)
    out = jax.block_until_ready(out)

    # Pure-JAX reference using the exact same dropout bits / keep mask.
    bits = jax.random.bits(kdrop, (B, H, S, S), dtype=jnp.uint32)
    keep = bits >= jnp.uint32(int(round(DROPOUT_P * (2 ** 32))))
    scores = jnp.einsum("bhqd,bhkd->bhqk", query, key,
                        precision=jax.lax.Precision.HIGHEST) / math.sqrt(D)
    scores = scores + attn_mask
    w = jax.nn.softmax(scores, axis=-1)
    w = jnp.where(keep, w / (1.0 - DROPOUT_P), 0.0)
    ref = jnp.einsum("bhqk,bhkd->bhqd", w, value,
                     precision=jax.lax.Precision.HIGHEST)

    assert out.shape == (B, H, S, D) and out.dtype == jnp.float32
    assert bool(jnp.all(jnp.isfinite(out)))
    assert bool(jnp.allclose(out, ref, rtol=2e-2, atol=2e-2)), \
        float(jnp.max(jnp.abs(out - ref)))
    print("KERNEL_OK")
</pallas_src>

<mosaic_0001>
module attributes {stable_mosaic.version = 11 : i64} {
  func.func @_attn_kernel(%arg0: i32, %arg1: i32, %arg2: memref<1x4x64x32xf32, #tpu.memory_space<vmem>>, %arg3: memref<1x4x128x32xf32, #tpu.memory_space<vmem>>, %arg4: memref<1x4x128x32xf32, #tpu.memory_space<vmem>>, %arg5: memref<1x1x64x128xf32, #tpu.memory_space<vmem>>, %arg6: memref<1x4x64x128xi32, #tpu.memory_space<vmem>>, %arg7: memref<1x64x128xf32, #tpu.memory_space<vmem>>) attributes {dimension_semantics = [#tpu.dimension_semantics<parallel>, #tpu.dimension_semantics<parallel>], iteration_bounds = array<i64: 1, 2>, scalar_prefetch = 0 : i64, scratch_operands = 0 : i64, tpu.core_type = #tpu.core_type<tc>, window_params = [{transform_indices = @transform_0, window_bounds = array<i64: 1, 4, 64, 32>}, {transform_indices = @transform_1, window_bounds = array<i64: 1, 4, 128, 32>}, {transform_indices = @transform_2, window_bounds = array<i64: 1, 4, 128, 32>}, {transform_indices = @transform_3, window_bounds = array<i64: 1, 1, 64, 128>}, {transform_indices = @transform_4, window_bounds = array<i64: 1, 4, 64, 128>}, {transform_indices = @transform_5, window_bounds = array<i64: 1, 64, 128>}]} {
    %c0 = arith.constant 0 : index
    %c0_0 = arith.constant 0 : index
    %c0_1 = arith.constant 0 : index
    %c0_2 = arith.constant 0 : index
    %0 = vector.load %arg2[%c0, %c0_0, %c0_1, %c0_2] : memref<1x4x64x32xf32, #tpu.memory_space<vmem>>, vector<1x4x64x32xf32>
    %1 = vector.shape_cast %0 : vector<1x4x64x32xf32> to vector<4x64x32xf32>
    %cst = arith.constant 0.176776692 : f32
    %2 = vector.broadcast %cst : f32 to vector<4x64x32xf32>
    %3 = arith.mulf %1, %2 : vector<4x64x32xf32>
    %c0_3 = arith.constant 0 : index
    %c0_4 = arith.constant 0 : index
    %c0_5 = arith.constant 0 : index
    %c0_6 = arith.constant 0 : index
    %4 = vector.load %arg3[%c0_3, %c0_4, %c0_5, %c0_6] : memref<1x4x128x32xf32, #tpu.memory_space<vmem>>, vector<1x4x128x32xf32>
    %5 = vector.shape_cast %4 : vector<1x4x128x32xf32> to vector<4x128x32xf32>
    %c0_7 = arith.constant 0 : index
    %c0_8 = arith.constant 0 : index
    %c0_9 = arith.constant 0 : index
    %c0_10 = arith.constant 0 : index
    %6 = vector.load %arg4[%c0_7, %c0_8, %c0_9, %c0_10] : memref<1x4x128x32xf32, #tpu.memory_space<vmem>>, vector<1x4x128x32xf32>
    %7 = vector.shape_cast %6 : vector<1x4x128x32xf32> to vector<4x128x32xf32>
    %c0_11 = arith.constant 0 : index
    %c0_12 = arith.constant 0 : index
    %c0_13 = arith.constant 0 : index
    %c0_14 = arith.constant 0 : index
    %8 = vector.load %arg5[%c0_11, %c0_12, %c0_13, %c0_14] : memref<1x1x64x128xf32, #tpu.memory_space<vmem>>, vector<1x1x64x128xf32>
    %9 = vector.shape_cast %8 : vector<1x1x64x128xf32> to vector<64x128xf32>
    %cst_15 = arith.constant dense<0.000000e+00> : vector<4x64x128xf32>
    %10 = tpu.matmul %3, %5, %cst_15 {dimension_numbers = #tpu.dot_dimension_numbers<[2], [2], [1], [1], [0, 0, 0, 1, 1, 1], [0], [0]>} : vector<4x64x32xf32>, vector<4x128x32xf32>, vector<4x64x128xf32> -> vector<4x64x128xf32>
    %11 = vector.shape_cast %9 : vector<64x128xf32> to vector<1x64x128xf32>
    %12 = vector.broadcast %11 : vector<1x64x128xf32> to vector<4x64x128xf32>
    %13 = arith.addf %10, %12 : vector<4x64x128xf32>
    %cst_16 = arith.constant dense<0xFF800000> : vector<4x64xf32>
    %14 = vector.multi_reduction <maximumf>, %13, %cst_16 [2] : vector<4x64x128xf32> to vector<4x64xf32>
    %15 = vector.shape_cast %14 : vector<4x64xf32> to vector<4x64x1xf32>
    %16 = vector.broadcast %15 : vector<4x64x1xf32> to vector<4x64x128xf32>
    %17 = arith.subf %13, %16 : vector<4x64x128xf32>
    %18 = math.exp %17 : vector<4x64x128xf32>
    %cst_17 = arith.constant dense<0.000000e+00> : vector<4x64xf32>
    %19 = vector.multi_reduction <add>, %18, %cst_17 [2] : vector<4x64x128xf32> to vector<4x64xf32>
    %20 = vector.shape_cast %19 : vector<4x64xf32> to vector<4x64x1xf32>
    %cst_18 = arith.constant 1.11111116 : f32
    %21 = vector.broadcast %cst_18 : f32 to vector<4x64x1xf32>
    %22 = arith.divf %21, %20 : vector<4x64x1xf32>
    %c0_19 = arith.constant 0 : index
    %c0_20 = arith.constant 0 : index
    %c0_21 = arith.constant 0 : index
    %c0_22 = arith.constant 0 : index
    %23 = vector.load %arg6[%c0_19, %c0_20, %c0_21, %c0_22] : memref<1x4x64x128xi32, #tpu.memory_space<vmem>>, vector<1x4x64x128xi32>
    %24 = vector.shape_cast %23 : vector<1x4x64x128xi32> to vector<4x64x128xi32>
    %c429496730_i32 = arith.constant 429496730 : i32
    %25 = vector.broadcast %c429496730_i32 : i32 to vector<4x64x128xi32>
    %26 = arith.cmpi uge, %24, %25 : vector<4x64x128xi32>
    %27 = vector.broadcast %22 : vector<4x64x1xf32> to vector<4x64x128xf32>
    %28 = arith.mulf %18, %27 : vector<4x64x128xf32>
    %cst_23 = arith.constant 0.000000e+00 : f32
    %29 = vector.broadcast %cst_23 : f32 to vector<4x64x128xf32>
    %30 = arith.select %26, %28, %29 : vector<4x64x128xi1>, vector<4x64x128xf32>
    %cst_24 = arith.constant dense<0.000000e+00> : vector<4x64x32xf32>
    %31 = tpu.matmul %30, %7, %cst_24 {dimension_numbers = #tpu.dot_dimension_numbers<[2], [1], [1], [2], [0, 0, 0, 1, 1, 2], [0], [0]>} : vector<4x64x128xf32>, vector<4x128x32xf32>, vector<4x64x32xf32> -> vector<4x64x32xf32>
    %32 = vector.extract_strided_slice %31 {offsets = [0, 0, 0], sizes = [1, 64, 32], strides = [1, 1, 1]} : vector<4x64x32xf32> to vector<1x64x32xf32>
    %33 = vector.shape_cast %32 : vector<1x64x32xf32> to vector<64x32xf32>
    %c0_25 = arith.constant 0 : index
    %c0_26 = arith.constant 0 : index
    %c0_27 = arith.constant 0 : index
    %34 = vector.load %arg7[%c0_25, %c0_26, %c0_27] : memref<1x64x128xf32, #tpu.memory_space<vmem>>, vector<1x64x32xf32>
    %35 = vector.shape_cast %34 : vector<1x64x32xf32> to vector<64x32xf32>
    %36 = vector.shape_cast %33 : vector<64x32xf32> to vector<1x64x32xf32>
    tpu.vector_store %arg7[%c0_25, %c0_26, %c0_27], %36 {strides = array<i32>} : memref<1x64x128xf32, #tpu.memory_space<vmem>>, vector<1x64x32xf32>,
    %37 = vector.extract_strided_slice %31 {offsets = [1, 0, 0], sizes = [1, 64, 32], strides = [1, 1, 1]} : vector<4x64x32xf32> to vector<1x64x32xf32>
    %38 = vector.shape_cast %37 : vector<1x64x32xf32> to vector<64x32xf32>
    %c0_28 = arith.constant 0 : index
    %c0_29 = arith.constant 0 : index
    %c32 = arith.constant 32 : index
    %39 = vector.load %arg7[%c0_28, %c0_29, %c32] : memref<1x64x128xf32, #tpu.memory_space<vmem>>, vector<1x64x32xf32>
    %40 = vector.shape_cast %39 : vector<1x64x32xf32> to vector<64x32xf32>
    %41 = vector.shape_cast %38 : vector<64x32xf32> to vector<1x64x32xf32>
    tpu.vector_store %arg7[%c0_28, %c0_29, %c32], %41 {strides = array<i32>} : memref<1x64x128xf32, #tpu.memory_space<vmem>>, vector<1x64x32xf32>,
    %42 = vector.extract_strided_slice %31 {offsets = [2, 0, 0], sizes = [1, 64, 32], strides = [1, 1, 1]} : vector<4x64x32xf32> to vector<1x64x32xf32>
    %43 = vector.shape_cast %42 : vector<1x64x32xf32> to vector<64x32xf32>
    %c0_30 = arith.constant 0 : index
    %c0_31 = arith.constant 0 : index
    %c64 = arith.constant 64 : index
    %44 = vector.load %arg7[%c0_30, %c0_31, %c64] : memref<1x64x128xf32, #tpu.memory_space<vmem>>, vector<1x64x32xf32>
    %45 = vector.shape_cast %44 : vector<1x64x32xf32> to vector<64x32xf32>
    %46 = vector.shape_cast %43 : vector<64x32xf32> to vector<1x64x32xf32>
    tpu.vector_store %arg7[%c0_30, %c0_31, %c64], %46 {strides = array<i32>} : memref<1x64x128xf32, #tpu.memory_space<vmem>>, vector<1x64x32xf32>,
    %47 = vector.extract_strided_slice %31 {offsets = [3, 0, 0], sizes = [1, 64, 32], strides = [1, 1, 1]} : vector<4x64x32xf32> to vector<1x64x32xf32>
    %48 = vector.shape_cast %47 : vector<1x64x32xf32> to vector<64x32xf32>
    %c0_32 = arith.constant 0 : index
    %c0_33 = arith.constant 0 : index
    %c96 = arith.constant 96 : index
    %49 = vector.load %arg7[%c0_32, %c0_33, %c96] : memref<1x64x128xf32, #tpu.memory_space<vmem>>, vector<1x64x32xf32>
    %50 = vector.shape_cast %49 : vector<1x64x32xf32> to vector<64x32xf32>
    %51 = vector.shape_cast %48 : vector<64x32xf32> to vector<1x64x32xf32>
    tpu.vector_store %arg7[%c0_32, %c0_33, %c96], %51 {strides = array<i32>} : memref<1x64x128xf32, #tpu.memory_space<vmem>>, vector<1x64x32xf32>,
    return
  }
  func.func @transform_0(%arg0: i32, %arg1: i32) -> (i32, i32, i32, i32) {
    %c0_i32 = arith.constant 0 : i32
    %c0_i32_0 = arith.constant 0 : i32
    %c0_i32_1 = arith.constant 0 : i32
    return %arg0, %c0_i32, %arg1, %c0_i32_0 : i32, i32, i32, i32
  }
  func.func @transform_1(%arg0: i32, %arg1: i32) -> (i32, i32, i32, i32) {
    %c0_i32 = arith.constant 0 : i32
    %c0_i32_0 = arith.constant 0 : i32
    %c0_i32_1 = arith.constant 0 : i32
    %c0_i32_2 = arith.constant 0 : i32
    return %arg0, %c0_i32, %c0_i32_0, %c0_i32_1 : i32, i32, i32, i32
  }
  func.func @transform_2(%arg0: i32, %arg1: i32) -> (i32, i32, i32, i32) {
    %c0_i32 = arith.constant 0 : i32
    %c0_i32_0 = arith.constant 0 : i32
    %c0_i32_1 = arith.constant 0 : i32
    %c0_i32_2 = arith.constant 0 : i32
    return %arg0, %c0_i32, %c0_i32_0, %c0_i32_1 : i32, i32, i32, i32
  }
  func.func @transform_3(%arg0: i32, %arg1: i32) -> (i32, i32, i32, i32) {
    %c0_i32 = arith.constant 0 : i32
    %c0_i32_0 = arith.constant 0 : i32
    %c0_i32_1 = arith.constant 0 : i32
    %c0_i32_2 = arith.constant 0 : i32
    return %c0_i32, %c0_i32_0, %arg1, %c0_i32_1 : i32, i32, i32, i32
  }
  func.func @transform_4(%arg0: i32, %arg1: i32) -> (i32, i32, i32, i32) {
    %c0_i32 = arith.constant 0 : i32
    %c0_i32_0 = arith.constant 0 : i32
    %c0_i32_1 = arith.constant 0 : i32
    return %arg0, %c0_i32, %arg1, %c0_i32_0 : i32, i32, i32, i32
  }
  func.func @transform_5(%arg0: i32, %arg1: i32) -> (i32, i32, i32) {
    %c0_i32 = arith.constant 0 : i32
    %c0_i32_0 = arith.constant 0 : i32
    return %arg0, %arg1, %c0_i32 : i32, i32, i32
  }
}

</mosaic_0001>

<bundles_post_ra>
// kernel: tpu_custom_call.1
= control target key start
LH: loop header
LB: loop body
LE: loop exit
PB: predicated region body
PF: predicated region fallthrough
CT: control target
= control target key end

     0   :  { %10 = vsyncpa [#allocation5], 0  ;;  %s5089_s0 = inlined_call_operand.vmem [shape: f32[1,4,128,32], index: 0, kind: input, shape index: {}]   ;;  %s5090_s1 = inlined_call_operand.vmem [shape: f32[1,4,128,32], index: 1, kind: input, shape index: {}]   ;;  %s5091_s2 = inlined_call_operand.vmem [shape: f32[1,4,128,32], index: 2, kind: input, shape index: {}]   ;;  %s5092_s3 = inlined_call_operand.vmem [shape: f32[1,1,128,128], index: 3, kind: input, shape index: {}]   ;;  %s5093_s4 = inlined_call_operand.vmem [shape: u32[1,4,128,128], index: 4, kind: input, shape index: {}]   ;;  %s5094_s5 = inlined_call_operand.hbm [shape: f32[1,128,128], index: 5, kind: output, shape index: {}]  }
   0x1   :  { %12 = vsyncpa [#allocation5 + $0x1], 0  ;;  %s3146_s18 = smov 0   ;;  %s3148_s19 = smov 0  }
   0x2   :  { %s3150_s20 = smov 0   ;;  %s3152_s21 = smov 0  }
   0x3   :  { %s3154_s22 = smov 0   ;;  %s3156_s23 = smov 0  }
   0x4 LB: > { %s2657_s24 = sadd.s32 4294967295, %s3109_s23   ;;  %s2658_s25 = sadd.s32 4294967294, %s3109_s23   ;;  %s3109_s23 = sphi %s3156_s23, %s18_s23   ;;  %s3105_s22 = sphi %s3154_s22, %s5180_s22   ;;  %s3101_s21 = sphi %s3152_s21, %s5179_s21   ;;  %s3097_s20 = sphi %s3150_s20, %s5178_s20   ;;  %s3093_s19 = sphi %s3148_s19, %s5177_s19   ;;  %s3089_s18 = sphi %s3146_s18, %s5176_s18  }
   0x5   : > { %s27_s26 = sadd.s32 1, %s3105_s22  ;;  %s39_s27 = sadd.s32 1, %s3097_s20 }
   0x6   : > { %p28_p0 = scmp.ge.s32.totalorder %s27_s26, 2  ;;  %p46_p1 = scmp.ne.s32.totalorder %s3097_s20, %s3093_s19 }
   0x7   : > { %p47_p2 = scmp.eq.s32.totalorder %s3109_s23, 0  ;;  %p184_p3 = scmp.eq.s32.totalorder %s2657_s24, 1 }
   0x8   : > { %s5182_s26 = smov (%p28_p0, %s27_s26), 0  ;;  %p189_p6 = scmp.ne.s32.totalorder %s3093_s19, %s3089_s18 }
   0x9   : > { %p3185_p4 = por %p47_p2, %p46_p1  ;;  %p3189_p5 = por %p184_p3, %p46_p1 }
   0xa   : > { %s35_s30 = ssub.s32 %s3105_s22, %s5182_s26  ;;  %p190_p8 = scmp.eq.s32.totalorder %s2658_s25, 1 }
   0xb   : > { %p37_p7 = scmp.eq.s32.totalorder %s35_s30, 0  ;;  %p2662_p10 = scmp.ge.s32.totalorder %s3109_s23, 2 }
   0xc   : > { %p3200_p9 = por %p190_p8, %p189_p6 }
   0xd   : > { %s3198_s6 = scalar_select %p37_p7, %s3097_s20, %s39_s27  }
   0xe   : > { %222 = sbr.rel (%p2662_p10) target bundleno = 91 (0x5b), region = 24 }
  0x13   : > { %225 = sbr.rel (!%p3185_p4) target bundleno = 55 (0x37), region = 28  ;;  %s227_s8 = sand.u32 (%p3185_p4), 1, %s3097_s20  }
  0x14   : > { %s2840_s9 = sshll.u32 (%p3185_p4), %s3105_s22, 6  ;;  %s2663_s10 = sshll.u32 (%p3185_p4), %s227_s8, 8 }
  0x15   : > { %s3214_s13 = scalar_lea.vmem (%p3185_p4), %s5089_s0, %s2840_s9  ;;  %s3219_s14 = scalar_lea.vmem (%p3185_p4), [#allocation2], %s2663_s10 }
  0x16   : > { %v325_v0 = vld [vmem:[%s3214_s13] sm:$0xff] (%p3185_p4)  ;;  %v327_v1 = vld [vmem:[%s3214_s13 + $0x8] sm:$0xff] (%p3185_p4)  ;;  %v329_v2 = vld [vmem:[%s3214_s13 + $0x10] sm:$0xff] (%p3185_p4) }
  0x17   : > { %326 = vst [vmem:[%s3219_s14] sm:$0xff] (%p3185_p4), %v325_v0  ;;  %v331_v3 = vld [vmem:[%s3214_s13 + $0x18] sm:$0xff] (%p3185_p4)  ;;  %v333_v4 = vld [vmem:[%s3214_s13 + $0x20] sm:$0xff] (%p3185_p4)  ;;  %v335_v5 = vld [vmem:[%s3214_s13 + $0x28] sm:$0xff] (%p3185_p4) }
  0x18   : > { %328 = vst [vmem:[%s3219_s14 + $0x8] sm:$0xff] %v327_v1  ;;  %v337_v6 = vld [vmem:[%s3214_s13 + $0x30] sm:$0xff]  ;;  %v339_v7 = vld [vmem:[%s3214_s13 + $0x38] sm:$0xff]  ;;  %v341_v8 = vld [vmem:[%s3214_s13 + $0x80] sm:$0xff] }
  0x19   : > { %330 = vst [vmem:[%s3219_s14 + $0x10] sm:$0xff] %v329_v2  ;;  %v343_v9 = vld [vmem:[%s3214_s13 + $0x88] sm:$0xff]  ;;  %v345_v10 = vld [vmem:[%s3214_s13 + $0x90] sm:$0xff]  ;;  %v347_v11 = vld [vmem:[%s3214_s13 + $0x98] sm:$0xff] }
  0x1a   : > { %332 = vst [vmem:[%s3219_s14 + $0x18] sm:$0xff] %v331_v3  ;;  %v349_v12 = vld [vmem:[%s3214_s13 + $0xa0] sm:$0xff]  ;;  %v351_v13 = vld [vmem:[%s3214_s13 + $0xa8] sm:$0xff]  ;;  %v353_v14 = vld [vmem:[%s3214_s13 + $0xb0] sm:$0xff] }
  0x1b   : > { %334 = vst [vmem:[%s3219_s14 + $0x20] sm:$0xff] %v333_v4  ;;  %v355_v15 = vld [vmem:[%s3214_s13 + $0xb8] sm:$0xff]  ;;  %v357_v16 = vld [vmem:[%s3214_s13 + $0x100] sm:$0xff]  ;;  %v359_v17 = vld [vmem:[%s3214_s13 + $0x108] sm:$0xff] }
  0x1c   : > { %336 = vst [vmem:[%s3219_s14 + $0x28] sm:$0xff] %v335_v5  ;;  %v361_v18 = vld [vmem:[%s3214_s13 + $0x110] sm:$0xff]  ;;  %v363_v19 = vld [vmem:[%s3214_s13 + $0x118] sm:$0xff]  ;;  %v365_v20 = vld [vmem:[%s3214_s13 + $0x120] sm:$0xff] }
  0x1d   : > { %338 = vst [vmem:[%s3219_s14 + $0x30] sm:$0xff] %v337_v6  ;;  %v367_v21 = vld [vmem:[%s3214_s13 + $0x128] sm:$0xff]  ;;  %v369_v22 = vld [vmem:[%s3214_s13 + $0x130] sm:$0xff]  ;;  %v371_v23 = vld [vmem:[%s3214_s13 + $0x138] sm:$0xff] }
  0x1e   : > { %340 = vst [vmem:[%s3219_s14 + $0x38] sm:$0xff] %v339_v7  ;;  %v373_v24 = vld [vmem:[%s3214_s13 + $0x180] sm:$0xff]  ;;  %v375_v25 = vld [vmem:[%s3214_s13 + $0x188] sm:$0xff]  ;;  %v377_v26 = vld [vmem:[%s3214_s13 + $0x190] sm:$0xff] }
  0x1f   : > { %342 = vst [vmem:[%s3219_s14 + $0x40] sm:$0xff] %v341_v8  ;;  %v379_v27 = vld [vmem:[%s3214_s13 + $0x198] sm:$0xff]  ;;  %v381_v28 = vld [vmem:[%s3214_s13 + $0x1a0] sm:$0xff]  ;;  %v383_v29 = vld [vmem:[%s3214_s13 + $0x1a8] sm:$0xff] }
  0x20   : > { %344 = vst [vmem:[%s3219_s14 + $0x48] sm:$0xff] %v343_v9  ;;  %v385_v30 = vld [vmem:[%s3214_s13 + $0x1b0] sm:$0xff]  ;;  %v387_v31 = vld [vmem:[%s3214_s13 + $0x1b8] sm:$0xff] }
  0x21   : > { %346 = vst [vmem:[%s3219_s14 + $0x50] sm:$0xff] %v345_v10 }
  0x22   : > { %348 = vst [vmem:[%s3219_s14 + $0x58] sm:$0xff] %v347_v11 }
  0x23   : > { %350 = vst [vmem:[%s3219_s14 + $0x60] sm:$0xff] %v349_v12 }
  0x24   : > { %352 = vst [vmem:[%s3219_s14 + $0x68] sm:$0xff] %v351_v13 }
  0x25   : > { %354 = vst [vmem:[%s3219_s14 + $0x70] sm:$0xff] %v353_v14 }
  0x26   : > { %356 = vst [vmem:[%s3219_s14 + $0x78] sm:$0xff] %v355_v15 }
  0x27   : > { %358 = vst [vmem:[%s3219_s14 + $0x80] sm:$0xff] %v357_v16 }
  0x28   : > { %360 = vst [vmem:[%s3219_s14 + $0x88] sm:$0xff] %v359_v17 }
  0x29   : > { %362 = vst [vmem:[%s3219_s14 + $0x90] sm:$0xff] %v361_v18 }
  0x2a   : > { %364 = vst [vmem:[%s3219_s14 + $0x98] sm:$0xff] %v363_v19 }
  0x2b   : > { %366 = vst [vmem:[%s3219_s14 + $0xa0] sm:$0xff] %v365_v20 }
  0x2c   : > { %368 = vst [vmem:[%s3219_s14 + $0xa8] sm:$0xff] %v367_v21 }
  0x2d   : > { %370 = vst [vmem:[%s3219_s14 + $0xb0] sm:$0xff] %v369_v22 }
  0x2e   : > { %372 = vst [vmem:[%s3219_s14 + $0xb8] sm:$0xff] %v371_v23 }
  0x2f   : > { %374 = vst [vmem:[%s3219_s14 + $0xc0] sm:$0xff] %v373_v24 }
  0x30   : > { %376 = vst [vmem:[%s3219_s14 + $0xc8] sm:$0xff] %v375_v25 }
  0x31   : > { %378 = vst [vmem:[%s3219_s14 + $0xd0] sm:$0xff] %v377_v26 }
  0x32   : > { %380 = vst [vmem:[%s3219_s14 + $0xd8] sm:$0xff] %v379_v27 }
  0x33   : > { %382 = vst [vmem:[%s3219_s14 + $0xe0] sm:$0xff] %v381_v28 }
  0x34   : > { %384 = vst [vmem:[%s3219_s14 + $0xe8] sm:$0xff] %v383_v29 }
  0x35   : > { %386 = vst [vmem:[%s3219_s14 + $0xf0] sm:$0xff] %v385_v30 }
  0x36   : > { %388 = vst [vmem:[%s3219_s14 + $0xf8] sm:$0xff] %v387_v31 }
  0x37 PF: > { %403 = sbr.rel (!%p3185_p4) target bundleno = 91 (0x5b), region = 70  ;;  %s405_s15 = sand.u32 (%p3185_p4), 1, %s3097_s20  }
  0x38   : > { %s2841_s16 = sshll.u32 (%p3185_p4), %s3105_s22, 6  ;;  %s2666_s17 = sshll.u32 (%p3185_p4), %s405_s15, 8 }
  0x39   : > { %s3289_s27 = scalar_lea.vmem (%p3185_p4), %s5093_s4, %s2841_s16  ;;  %s3294_s28 = scalar_lea.vmem (%p3185_p4), [#allocation3], %s2666_s17 }
  0x3a   : > { %v503_v32 = vld [vmem:[%s3289_s27] sm:$0xff] (%p3185_p4)  ;;  %v505_v33 = vld [vmem:[%s3289_s27 + $0x8] sm:$0xff] (%p3185_p4)  ;;  %v507_v34 = vld [vmem:[%s3289_s27 + $0x10] sm:$0xff] (%p3185_p4) }
  0x3b   : > { %504 = vst [vmem:[%s3294_s28] sm:$0xff] (%p3185_p4), %v503_v32  ;;  %v509_v35 = vld [vmem:[%s3289_s27 + $0x18] sm:$0xff] (%p3185_p4)  ;;  %v511_v36 = vld [vmem:[%s3289_s27 + $0x20] sm:$0xff] (%p3185_p4)  ;;  %v513_v37 = vld [vmem:[%s3289_s27 + $0x28] sm:$0xff] (%p3185_p4) }
  0x3c   : > { %506 = vst [vmem:[%s3294_s28 + $0x8] sm:$0xff] %v505_v33  ;;  %v515_v38 = vld [vmem:[%s3289_s27 + $0x30] sm:$0xff]  ;;  %v517_v39 = vld [vmem:[%s3289_s27 + $0x38] sm:$0xff]  ;;  %v519_v40 = vld [vmem:[%s3289_s27 + $0x80] sm:$0xff] }
  0x3d   : > { %508 = vst [vmem:[%s3294_s28 + $0x10] sm:$0xff] %v507_v34  ;;  %v521_v41 = vld [vmem:[%s3289_s27 + $0x88] sm:$0xff]  ;;  %v523_v42 = vld [vmem:[%s3289_s27 + $0x90] sm:$0xff]  ;;  %v525_v43 = vld [vmem:[%s3289_s27 + $0x98] sm:$0xff] }
  0x3e   : > { %510 = vst [vmem:[%s3294_s28 + $0x18] sm:$0xff] %v509_v35  ;;  %v527_v44 = vld [vmem:[%s3289_s27 + $0xa0] sm:$0xff]  ;;  %v529_v45 = vld [vmem:[%s3289_s27 + $0xa8] sm:$0xff]  ;;  %v531_v46 = vld [vmem:[%s3289_s27 + $0xb0] sm:$0xff] }
  0x3f   : > { %512 = vst [vmem:[%s3294_s28 + $0x20] sm:$0xff] %v511_v36  ;;  %v533_v47 = vld [vmem:[%s3289_s27 + $0xb8] sm:$0xff]  ;;  %v535_v48 = vld [vmem:[%s3289_s27 + $0x100] sm:$0xff]  ;;  %v537_v49 = vld [vmem:[%s3289_s27 + $0x108] sm:$0xff] }
  0x40   : > { %514 = vst [vmem:[%s3294_s28 + $0x28] sm:$0xff] %v513_v37  ;;  %v539_v50 = vld [vmem:[%s3289_s27 + $0x110] sm:$0xff]  ;;  %v541_v51 = vld [vmem:[%s3289_s27 + $0x118] sm:$0xff]  ;;  %v543_v52 = vld [vmem:[%s3289_s27 + $0x120] sm:$0xff] }
  0x41   : > { %516 = vst [vmem:[%s3294_s28 + $0x30] sm:$0xff] %v515_v38  ;;  %v545_v53 = vld [vmem:[%s3289_s27 + $0x128] sm:$0xff]  ;;  %v547_v54 = vld [vmem:[%s3289_s27 + $0x130] sm:$0xff]  ;;  %v549_v55 = vld [vmem:[%s3289_s27 + $0x138] sm:$0xff] }
  0x42   : > { %518 = vst [vmem:[%s3294_s28 + $0x38] sm:$0xff] %v517_v39  ;;  %v551_v56 = vld [vmem:[%s3289_s27 + $0x180] sm:$0xff]  ;;  %v553_v57 = vld [vmem:[%s3289_s27 + $0x188] sm:$0xff]  ;;  %v555_v58 = vld [vmem:[%s3289_s27 + $0x190] sm:$0xff] }
  0x43   : > { %520 = vst [vmem:[%s3294_s28 + $0x40] sm:$0xff] %v519_v40  ;;  %v557_v59 = vld [vmem:[%s3289_s27 + $0x198] sm:$0xff]  ;;  %v559_v60 = vld [vmem:[%s3289_s27 + $0x1a0] sm:$0xff]  ;;  %v561_v61 = vld [vmem:[%s3289_s27 + $0x1a8] sm:$0xff] }
  0x44   : > { %522 = vst [vmem:[%s3294_s28 + $0x48] sm:$0xff] %v521_v41  ;;  %v563_v62 = vld [vmem:[%s3289_s27 + $0x1b0] sm:$0xff]  ;;  %v565_v63 = vld [vmem:[%s3289_s27 + $0x1b8] sm:$0xff] }
  0x45   : > { %524 = vst [vmem:[%s3294_s28 + $0x50] sm:$0xff] %v523_v42 }
  0x46   : > { %526 = vst [vmem:[%s3294_s28 + $0x58] sm:$0xff] %v525_v43 }
  0x47   : > { %528 = vst [vmem:[%s3294_s28 + $0x60] sm:$0xff] %v527_v44 }
  0x48   : > { %530 = vst [vmem:[%s3294_s28 + $0x68] sm:$0xff] %v529_v45 }
  0x49   : > { %532 = vst [vmem:[%s3294_s28 + $0x70] sm:$0xff] %v531_v46 }
  0x4a   : > { %534 = vst [vmem:[%s3294_s28 + $0x78] sm:$0xff] %v533_v47 }
  0x4b   : > { %536 = vst [vmem:[%s3294_s28 + $0x80] sm:$0xff] %v535_v48 }
  0x4c   : > { %538 = vst [vmem:[%s3294_s28 + $0x88] sm:$0xff] %v537_v49 }
  0x4d   : > { %540 = vst [vmem:[%s3294_s28 + $0x90] sm:$0xff] %v539_v50 }
  0x4e   : > { %542 = vst [vmem:[%s3294_s28 + $0x98] sm:$0xff] %v541_v51 }
  0x4f   : > { %544 = vst [vmem:[%s3294_s28 + $0xa0] sm:$0xff] %v543_v52 }
  0x50   : > { %546 = vst [vmem:[%s3294_s28 + $0xa8] sm:$0xff] %v545_v53 }
  0x51   : > { %548 = vst [vmem:[%s3294_s28 + $0xb0] sm:$0xff] %v547_v54 }
  0x52   : > { %550 = vst [vmem:[%s3294_s28 + $0xb8] sm:$0xff] %v549_v55 }
  0x53   : > { %552 = vst [vmem:[%s3294_s28 + $0xc0] sm:$0xff] %v551_v56 }
  0x54   : > { %554 = vst [vmem:[%s3294_s28 + $0xc8] sm:$0xff] %v553_v57 }
  0x55   : > { %556 = vst [vmem:[%s3294_s28 + $0xd0] sm:$0xff] %v555_v58 }
  0x56   : > { %558 = vst [vmem:[%s3294_s28 + $0xd8] sm:$0xff] %v557_v59 }
  0x57   : > { %560 = vst [vmem:[%s3294_s28 + $0xe0] sm:$0xff] %v559_v60 }
  0x58   : > { %562 = vst [vmem:[%s3294_s28 + $0xe8] sm:$0xff] %v561_v61 }
  0x59   : > { %564 = vst [vmem:[%s3294_s28 + $0xf0] sm:$0xff] %v563_v62 }
  0x5a   : > { %566 = vst [vmem:[%s3294_s28 + $0xf8] sm:$0xff] %v565_v63 }
  0x5b PF: > { %p2669_p11 = scmp.ge.s32.totalorder %s3109_s23, 1  ;;  %p571_p12 = scmp.lt.s32.totalorder %s3109_s23, 3 }
  0x5d   : > { %p572_p13 = pnand %p2669_p11, %p571_p12 }
  0x5e   : > { %s3564_s28 = sand.u32 (!%p572_p13), 1, %s3093_s19   ;;  %s2673_s27 = sshll.u32 (!%p572_p13), %s3101_s21, 3 }
  0x5f   : > { %575 = sbr.rel (%p572_p13) target bundleno = 925 (0x39d), region = 108  ;;  %s2670_s15 = sshll.u32 (!%p572_p13), %s3564_s28, 8 }
  0x60   : > { %s3606_s12 = scalar_lea.vmem (!%p572_p13), [#allocation2], %s2670_s15  ;;  %p643_p0 = scmp.lt.s32.totalorder (!%p572_p13), %s2673_s27, 15 }
  0x61   : > { %s4094_s17 = scalar_lea.vmem (!%p572_p13), [#allocation3], %s2670_s15  ;;  %s3111_s9 = smov (!%p572_p13), 32  }
  0x62   : > { %s3113_s11 = smov (!%p572_p13), 96   ;;  %s2842_s13 = sshll.u32 (!%p572_p13), %s3101_s21, 6 }
  0x63   : > { %s2508_s15 = scalar_lea.hbm (!%p572_p13), %s5094_s5, %s2842_s13  ;;  %s2495_s21 = scalar_lea.sflag (!%p572_p13), [#allocation5], %s3564_s28 }
  0x64   : > { %v729_v0 = vld [vmem:[%s5090_s1 + $0x78] sm:$0xff]  ;;  %vm850_vm0 = vcmask 261120   ;;  %v728_v4 = vld [vmem:[%s5090_s1 + $0x70] sm:$0xff]  ;;  %v727_v8 = vld [vmem:[%s5090_s1 + $0x68] sm:$0xff]  ;;  %s5184_s27 = smov (!%p643_p0, %s2673_s27), 15  ;;  %s2511_s25 = sshll.u32 %s2508_s15, 4  ;;  %s2512_s25 = int_to_ptr.hbm [resolvable:$true] %s2511_s25 }
  0x65   : > { %v745_v1 = vld [vmem:[%s5090_s1 + $0xf8] sm:$0xff]  ;;  %2675 = vmatpush.xpose.msk.msra.mxu0 %vm850_vm0, %v729_v0  ;;  %v744_v5 = vld [vmem:[%s5090_s1 + $0xf0] sm:$0xff]  ;;  %v743_v9 = vld [vmem:[%s5090_s1 + $0xe8] sm:$0xff]  ;;  %s2674_s30 = sshll.u32 %s5184_s27, 3  ;;  %s3045_s27 = sshra.s32 %s2512_s25, 4  ;;  %s3046_s27 = int_to_ptr.hbm [resolvable:$true] %s3045_s27 }
  0x66   : > { %v761_v2 = vld [vmem:[%s5090_s1 + $0x178] sm:$0xff]  ;;  %2699 = vmatpush.xpose.msk.msra.mxu1 %vm850_vm0, %v745_v1  ;;  %v760_v6 = vld [vmem:[%s5090_s1 + $0x170] sm:$0xff]  ;;  %v759_v10 = vld [vmem:[%s5090_s1 + $0x168] sm:$0xff]  ;;  %s3689_s10 = scalar_lea.vmem %s5092_s3, %s2674_s30  ;;  %s3047_s30 = scalar_lea.hbm %s3046_s27, 64 }
  0x67   : > { %v777_v3 = vld [vmem:[%s5090_s1 + $0x1f8] sm:$0xff]  ;;  %2723 = vmatpush.xpose.msk.msra.mxu2 %vm850_vm0, %v761_v2  ;;  %v776_v7 = vld [vmem:[%s5090_s1 + $0x1f0] sm:$0xff]  ;;  %v775_v11 = vld [vmem:[%s5090_s1 + $0x1e8] sm:$0xff]  ;;  %p3048_p1 = scmp.ne.s32.totalorder %s3046_s27, %s3047_s30  ;;  %p3052_p4 = scmp.lt.s32.totalorder %s3046_s27, %s5094_s5 }
  0x68   : > { %2747 = vmatpush.xpose.msk.msra.mxu3 %vm850_vm0, %v777_v3  ;;  %v726_v12 = vld [vmem:[%s5090_s1 + $0x60] sm:$0xff]  ;;  %v725_v16 = vld [vmem:[%s5090_s1 + $0x58] sm:$0xff]  ;;  %v724_v20 = vld [vmem:[%s5090_s1 + $0x50] sm:$0xff] }
  0x69   : > { %2676 = vmatpush.xpose.msk.msra.mxu0 %vm850_vm0, %v728_v4  ;;  %v742_v13 = vld [vmem:[%s5090_s1 + $0xe0] sm:$0xff]  ;;  %v741_v17 = vld [vmem:[%s5090_s1 + $0xd8] sm:$0xff]  ;;  %v740_v21 = vld [vmem:[%s5090_s1 + $0xd0] sm:$0xff]  ;;  %p3049_p2 = pnand %p3048_p1, %p3189_p5 }
  0x6a   : > { %2700 = vmatpush.xpose.msk.msra.mxu1 %vm850_vm0, %v744_v5  ;;  %v758_v14 = vld [vmem:[%s5090_s1 + $0x160] sm:$0xff]  ;;  %v757_v18 = vld [vmem:[%s5090_s1 + $0x158] sm:$0xff]  ;;  %v756_v22 = vld [vmem:[%s5090_s1 + $0x150] sm:$0xff] }
  0x6b   : > { %2724 = vmatpush.xpose.msk.msra.mxu2 %vm850_vm0, %v760_v6  ;;  %v774_v15 = vld [vmem:[%s5090_s1 + $0x1e0] sm:$0xff]  ;;  %v773_v19 = vld [vmem:[%s5090_s1 + $0x1d8] sm:$0xff]  ;;  %v772_v23 = vld [vmem:[%s5090_s1 + $0x1d0] sm:$0xff]  ;;  %p3050_p3 = pneg %p3049_p2 }
  0x6c   : > { %2748 = vmatpush.xpose.msk.msra.mxu3 %vm850_vm0, %v776_v7  ;;  %v723_v24 = vld [vmem:[%s5090_s1 + $0x48] sm:$0xff]  ;;  %v722_v28 = vld [vmem:[%s5090_s1 + $0x40] sm:$0xff]  ;;  %v721_v32 = vld [vmem:[%s5090_s1 + $0x38] sm:$0xff] }
  0x6d   : > { %2677 = vmatpush.xpose.msk.msra.mxu0 %vm850_vm0, %v727_v8  ;;  %v739_v25 = vld [vmem:[%s5090_s1 + $0xc8] sm:$0xff]  ;;  %v738_v29 = vld [vmem:[%s5090_s1 + $0xc0] sm:$0xff]  ;;  %v737_v33 = vld [vmem:[%s5090_s1 + $0xb8] sm:$0xff] }
  0x6e   : > { %2701 = vmatpush.xpose.msk.msra.mxu1 %vm850_vm0, %v743_v9  ;;  %v755_v26 = vld [vmem:[%s5090_s1 + $0x148] sm:$0xff]  ;;  %v754_v30 = vld [vmem:[%s5090_s1 + $0x140] sm:$0xff]  ;;  %v753_v34 = vld [vmem:[%s5090_s1 + $0x138] sm:$0xff] }
  0x6f   : > { %2725 = vmatpush.xpose.msk.msra.mxu2 %vm850_vm0, %v759_v10  ;;  %v771_v27 = vld [vmem:[%s5090_s1 + $0x1c8] sm:$0xff]  ;;  %v770_v31 = vld [vmem:[%s5090_s1 + $0x1c0] sm:$0xff]  ;;  %v769_v35 = vld [vmem:[%s5090_s1 + $0x1b8] sm:$0xff] }
  0x70   : > { %2749 = vmatpush.xpose.msk.msra.mxu3 %vm850_vm0, %v775_v11  ;;  %v720_v36 = vld [vmem:[%s5090_s1 + $0x30] sm:$0xff]  ;;  %v719_v40 = vld [vmem:[%s5090_s1 + $0x28] sm:$0xff]  ;;  %v718_v44 = vld [vmem:[%s5090_s1 + $0x20] sm:$0xff] }
  0x71   : > { %2678 = vmatpush.xpose.msk.msra.mxu0 %vm850_vm0, %v726_v12  ;;  %v736_v37 = vld [vmem:[%s5090_s1 + $0xb0] sm:$0xff]  ;;  %v735_v41 = vld [vmem:[%s5090_s1 + $0xa8] sm:$0xff]  ;;  %v734_v45 = vld [vmem:[%s5090_s1 + $0xa0] sm:$0xff] }
  0x72   : > { %2702 = vmatpush.xpose.msk.msra.mxu1 %vm850_vm0, %v742_v13  ;;  %v752_v38 = vld [vmem:[%s5090_s1 + $0x130] sm:$0xff]  ;;  %v751_v42 = vld [vmem:[%s5090_s1 + $0x128] sm:$0xff]  ;;  %v750_v46 = vld [vmem:[%s5090_s1 + $0x120] sm:$0xff] }
  0x73   : > { %2726 = vmatpush.xpose.msk.msra.mxu2 %vm850_vm0, %v758_v14  ;;  %v768_v39 = vld [vmem:[%s5090_s1 + $0x1b0] sm:$0xff]  ;;  %v767_v43 = vld [vmem:[%s5090_s1 + $0x1a8] sm:$0xff]  ;;  %v766_v47 = vld [vmem:[%s5090_s1 + $0x1a0] sm:$0xff] }
  0x74   : > { %2750 = vmatpush.xpose.msk.msra.mxu3 %vm850_vm0, %v774_v15  ;;  %v717_v48 = vld [vmem:[%s5090_s1 + $0x18] sm:$0xff]  ;;  %v716_v52 = vld [vmem:[%s5090_s1 + $0x10] sm:$0xff]  ;;  %v715_v56 = vld [vmem:[%s5090_s1 + $0x8] sm:$0xff] }
  0x75   : > { %2679 = vmatpush.xpose.msk.msra.mxu0 %vm850_vm0, %v725_v16  ;;  %v733_v49 = vld [vmem:[%s5090_s1 + $0x98] sm:$0xff]  ;;  %v732_v53 = vld [vmem:[%s5090_s1 + $0x90] sm:$0xff]  ;;  %v731_v57 = vld [vmem:[%s5090_s1 + $0x88] sm:$0xff] }
  0x76   : > { %2703 = vmatpush.xpose.msk.msra.mxu1 %vm850_vm0, %v741_v17  ;;  %v749_v50 = vld [vmem:[%s5090_s1 + $0x118] sm:$0xff]  ;;  %v748_v54 = vld [vmem:[%s5090_s1 + $0x110] sm:$0xff]  ;;  %v747_v58 = vld [vmem:[%s5090_s1 + $0x108] sm:$0xff] }
  0x77   : > { %2727 = vmatpush.xpose.msk.msra.mxu2 %vm850_vm0, %v757_v18  ;;  %v765_v51 = vld [vmem:[%s5090_s1 + $0x198] sm:$0xff]  ;;  %v764_v55 = vld [vmem:[%s5090_s1 + $0x190] sm:$0xff]  ;;  %v763_v59 = vld [vmem:[%s5090_s1 + $0x188] sm:$0xff] }
  0x78   : > { %2751 = vmatpush.xpose.msk.msra.mxu3 %vm850_vm0, %v773_v19  ;;  %v714_v60 = vld [vmem:[%s5090_s1] sm:$0xff]  ;;  %v659_v8 = vld [vmem:[%s3606_s12 + $0x48] sm:$0xff]  ;;  %v652_v16 = vld [vmem:[%s3606_s12 + $0x10] sm:$0xff] }
  0x79   : > { %2680 = vmatpush.xpose.msk.msra.mxu0 %vm850_vm0, %v724_v20  ;;  %v650_v61 = vld [vmem:[%s3606_s12] sm:$0xff]  ;;  %v651_v9 = vld [vmem:[%s3606_s12 + $0x8] sm:$0xff]  ;;  %v691_v12 = vmul.f32 0.17677669, %v659_v8  ;;  %v660_v17 = vld [vmem:[%s3606_s12 + $0x50] sm:$0xff] }
  0x7a   : > { %2704 = vmatpush.xpose.msk.msra.mxu1 %vm850_vm0, %v740_v21  ;;  %v658_v62 = vld [vmem:[%s3606_s12 + $0x40] sm:$0xff]  ;;  %v682_v4 = vmul.f32 0.17677669, %v650_v61  ;;  %v667_v10 = vld [vmem:[%s3606_s12 + $0x88] sm:$0xff]  ;;  %v683_v13 = vmul.f32 0.17677669, %v651_v9 }
  0x7b   : > { %2728 = vmatpush.xpose.msk.msra.mxu2 %vm850_vm0, %v756_v22  ;;  %v730_v63 = vld [vmem:[%s5090_s1 + $0x80] sm:$0xff]  ;;  %v690_v5 = vmul.f32 0.17677669, %v658_v62  ;;  %v675_v11 = vld [vmem:[%s3606_s12 + $0xc8] sm:$0xff]  ;;  %v699_v14 = vmul.f32 0.17677669, %v667_v10 }
  0x7c   : > { %2752 = vmatpush.xpose.msk.msra.mxu3 %vm850_vm0, %v772_v23  ;;  %v666_v0 = vld [vmem:[%s3606_s12 + $0x80] sm:$0xff]  ;;  %v707_v15 = vmul.f32 0.17677669, %v675_v11  ;;  %v676_v18 = vld [vmem:[%s3606_s12 + $0xd0] sm:$0xff]  ;;  %v684_v20 = vmul.f32 0.17677669, %v652_v16 }
  0x7d   : > { %2681 = vmatpush.xpose.msk.msra.mxu0 %vm850_vm0, %v723_v24  ;;  %v674_v1 = vld [vmem:[%s3606_s12 + $0xc0] sm:$0xff]  ;;  %v698_v6 = vmul.f32 0.17677669, %v666_v0  ;;  %v668_v19 = vld [vmem:[%s3606_s12 + $0x90] sm:$0xff]  ;;  %v692_v21 = vmul.f32 0.17677669, %v660_v17 }
  0x7e   : > { %2705 = vmatpush.xpose.msk.msra.mxu1 %vm850_vm0, %v739_v25  ;;  %v746_v2 = vld [vmem:[%s5090_s1 + $0x100] sm:$0xff]  ;;  %v706_v7 = vmul.f32 0.17677669, %v674_v1  ;;  %v708_v22 = vmul.f32 0.17677669, %v676_v18  ;;  %v653_v24 = vld [vmem:[%s3606_s12 + $0x18] sm:$0xff] }
  0x7f   : > { %2729 = vmatpush.xpose.msk.msra.mxu2 %vm850_vm0, %v755_v26  ;;  %v762_v3 = vld [vmem:[%s5090_s1 + $0x180] sm:$0xff]  ;;  %v700_v23 = vmul.f32 0.17677669, %v668_v19  ;;  %v661_v25 = vld [vmem:[%s3606_s12 + $0x58] sm:$0xff]  ;;  %v844_v17 = vld [vmem:[%s3689_s10 + $0x10] sm:$0xff] }
  0x80   : > { %2753 = vmatpush.xpose.msk.msra.mxu3 %vm850_vm0, %v771_v27  ;;  %v677_v26 = vld [vmem:[%s3606_s12 + $0xd8] sm:$0xff]  ;;  %v842_v62 = vld [vmem:[%s3689_s10] sm:$0xff] }
  0x81   : > { %2682 = vmatpush.xpose.msk.msra.mxu0 %vm850_vm0, %v722_v28  ;;  %v669_v27 = vld [vmem:[%s3606_s12 + $0x98] sm:$0xff]  ;;  %v685_v28 = vmul.f32 0.17677669, %v653_v24 }
  0x82   : > { %2706 = vmatpush.xpose.msk.msra.mxu1 %vm850_vm0, %v738_v29  ;;  %v693_v29 = vmul.f32 0.17677669, %v661_v25  ;;  %v657_v25 = vld [vmem:[%s3606_s12 + $0x38] sm:$0xff] }
  0x83   : > { %2730 = vmatpush.xpose.msk.msra.mxu2 %vm850_vm0, %v754_v30  ;;  %v709_v30 = vmul.f32 0.17677669, %v677_v26  ;;  %v845_v26 = vld [vmem:[%s3689_s10 + $0x18] sm:$0xff] }
  0x84   : > { %2754 = vmatpush.xpose.msk.msra.mxu3 %vm850_vm0, %v770_v31  ;;  %v701_v31 = vmul.f32 0.17677669, %v669_v27  ;;  %v689_v27 = vmul.f32 0.17677669, %v657_v25 }
  0x85   : > { %2683 = vmatpush.xpose.msk.msra.mxu0 %vm850_vm0, %v721_v32  ;;  %v654_v32 = vld [vmem:[%s3606_s12 + $0x20] sm:$0xff] }
  0x86   : > { %2707 = vmatpush.xpose.msk.msra.mxu1 %vm850_vm0, %v737_v33  ;;  %v662_v33 = vld [vmem:[%s3606_s12 + $0x60] sm:$0xff] }
  0x87   : > { %2731 = vmatpush.xpose.msk.msra.mxu2 %vm850_vm0, %v753_v34  ;;  %v678_v34 = vld [vmem:[%s3606_s12 + $0xe0] sm:$0xff] }
  0x88   : > { %2755 = vmatpush.xpose.msk.msra.mxu3 %vm850_vm0, %v769_v35  ;;  %v670_v35 = vld [vmem:[%s3606_s12 + $0xa0] sm:$0xff] }
  0x89   : > { %2684 = vmatpush.xpose.msk.msra.mxu0 %vm850_vm0, %v720_v36  ;;  %v686_v36 = vmul.f32 0.17677669, %v654_v32 }
  0x8a   : > { %2708 = vmatpush.xpose.msk.msra.mxu1 %vm850_vm0, %v736_v37  ;;  %v694_v37 = vmul.f32 0.17677669, %v662_v33  ;;  %v846_v33 = vld [vmem:[%s3689_s10 + $0x20] sm:$0xff] }
  0x8b   : > { %2732 = vmatpush.xpose.msk.msra.mxu2 %vm850_vm0, %v752_v38  ;;  %v710_v38 = vmul.f32 0.17677669, %v678_v34 }
  0x8c   : > { %2756 = vmatpush.xpose.msk.msra.mxu3 %vm850_vm0, %v768_v39  ;;  %v702_v39 = vmul.f32 0.17677669, %v670_v35 }
  0x8d   : > { %2685 = vmatpush.xpose.msk.msra.mxu0 %vm850_vm0, %v719_v40  ;;  %v655_v40 = vld [vmem:[%s3606_s12 + $0x28] sm:$0xff] }
  0x8e   : > { %2709 = vmatpush.xpose.msk.msra.mxu1 %vm850_vm0, %v735_v41  ;;  %v663_v41 = vld [vmem:[%s3606_s12 + $0x68] sm:$0xff] }
  0x8f   : > { %2733 = vmatpush.xpose.msk.msra.mxu2 %vm850_vm0, %v751_v42  ;;  %v679_v42 = vld [vmem:[%s3606_s12 + $0xe8] sm:$0xff] }
  0x90   : > { %2757 = vmatpush.xpose.msk.msra.mxu3 %vm850_vm0, %v767_v43  ;;  %v671_v43 = vld [vmem:[%s3606_s12 + $0xa8] sm:$0xff] }
  0x91   : > { %2686 = vmatpush.xpose.msk.msra.mxu0 %vm850_vm0, %v718_v44  ;;  %v687_v44 = vmul.f32 0.17677669, %v655_v40  ;;  %v847_v40 = vld [vmem:[%s3689_s10 + $0x28] sm:$0xff] }
  0x92   : > { %2710 = vmatpush.xpose.msk.msra.mxu1 %vm850_vm0, %v734_v45  ;;  %v695_v45 = vmul.f32 0.17677669, %v663_v41 }
  0x93   : > { %2734 = vmatpush.xpose.msk.msra.mxu2 %vm850_vm0, %v750_v46  ;;  %v711_v46 = vmul.f32 0.17677669, %v679_v42 }
  0x94   : > { %2758 = vmatpush.xpose.msk.msra.mxu3 %vm850_vm0, %v766_v47  ;;  %v703_v47 = vmul.f32 0.17677669, %v671_v43 }
  0x95   : > { %2687 = vmatpush.xpose.msk.msra.mxu0 %vm850_vm0, %v717_v48  ;;  %v664_v48 = vld [vmem:[%s3606_s12 + $0x70] sm:$0xff] }
  0x96   : > { %2711 = vmatpush.xpose.msk.msra.mxu1 %vm850_vm0, %v733_v49  ;;  %v656_v49 = vld [vmem:[%s3606_s12 + $0x30] sm:$0xff] }
  0x97   : > { %2735 = vmatpush.xpose.msk.msra.mxu2 %vm850_vm0, %v749_v50  ;;  %v680_v50 = vld [vmem:[%s3606_s12 + $0xf0] sm:$0xff] }
  0x98   : > { %2759 = vmatpush.xpose.msk.msra.mxu3 %vm850_vm0, %v765_v51  ;;  %v672_v51 = vld [vmem:[%s3606_s12 + $0xb0] sm:$0xff] }
  0x99   : > { %2688 = vmatpush.xpose.msk.msra.mxu0 %vm850_vm0, %v716_v52  ;;  %v696_v52 = vmul.f32 0.17677669, %v664_v48 }
  0x9a   : > { %2712 = vmatpush.xpose.msk.msra.mxu1 %vm850_vm0, %v732_v53  ;;  %v688_v53 = vmul.f32 0.17677669, %v656_v49 }
  0x9b   : > { %2736 = vmatpush.xpose.msk.msra.mxu2 %vm850_vm0, %v748_v54  ;;  %v712_v54 = vmul.f32 0.17677669, %v680_v50 }
  0x9c   : > { %2760 = vmatpush.xpose.msk.msra.mxu3 %vm850_vm0, %v764_v55  ;;  %v704_v55 = vmul.f32 0.17677669, %v672_v51 }
  0x9d   : > { %2689 = vmatpush.xpose.msk.msra.mxu0 %vm850_vm0, %v715_v56  ;;  %v665_v56 = vld [vmem:[%s3606_s12 + $0x78] sm:$0xff] }
  0x9e   : > { %2713 = vmatpush.xpose.msk.msra.mxu1 %vm850_vm0, %v731_v57  ;;  %v673_v57 = vld [vmem:[%s3606_s12 + $0xb8] sm:$0xff] }
  0x9f   : > { %2737 = vmatpush.xpose.msk.msra.mxu2 %vm850_vm0, %v747_v58  ;;  %v681_v58 = vld [vmem:[%s3606_s12 + $0xf8] sm:$0xff]  ;;  %s2672_s12 = sshll.u32 %s3564_s28, 6 }
  0xa0   : > { %2761 = vmatpush.xpose.msk.msra.mxu3 %vm850_vm0, %v763_v59  ;;  %v697_v59 = vmul.f32 0.17677669, %v665_v56  ;;  %v713_v61 = vmul.f32 0.17677669, %v681_v58 }
  0xa1   : > { %2690 = vmatpush.xpose.msk.msra.mxu0 %vm850_vm0, %v714_v60  ;;  %v705_v60 = vmul.f32 0.17677669, %v673_v57 }
  0xa2   : > { %2714 = vmatpush.xpose.msk.msra.mxu1 %vm850_vm0, %v730_v63 }
  0xa3   : > { %2738 = vmatpush.xpose.msk.msra.mxu2 %vm850_vm0, %v746_v2 }
  0xa4   : > { %2762 = vmatpush.xpose.msk.msra.mxu3 %vm850_vm0, %v762_v3  ;;  %2691 = vmatmul.msk.f32.vlgmr.msra.gmra.mxu0 %vm850_vm0, %v682_v4  ;;  %v843_v3 = vld [vmem:[%s3689_s10 + $0x8] sm:$0xff] }
  0xa5   : > { %2715 = vmatmul.msk.f32.vlgmr.msra.gmra.mxu1 %vm850_vm0, %v690_v5 }
  0xa6   : > { %2739 = vmatmul.msk.f32.vlgmr.msra.gmra.mxu2 %vm850_vm0, %v698_v6 }
  0xa7   : > { %2763 = vmatmul.msk.f32.vlgmr.msra.gmra.mxu3 %vm850_vm0, %v706_v7 }
  0xac   : > { %2692 = vmatmul.msk.f32.gmra.mxu0 %vm850_vm0, %v683_v13 }
  0xad   : > { %2716 = vmatmul.msk.f32.gmra.mxu1 %vm850_vm0, %v691_v12 }
  0xae   : > { %2740 = vmatmul.msk.f32.gmra.mxu2 %vm850_vm0, %v699_v14 }
  0xaf   : > { %2764 = vmatmul.msk.f32.gmra.mxu3 %vm850_vm0, %v707_v15 }
  0xb4   : > { %2693 = vmatmul.msk.f32.gmra.mxu0 %vm850_vm0, %v684_v20 }
  0xb5   : > { %2717 = vmatmul.msk.f32.gmra.mxu1 %vm850_vm0, %v692_v21 }
  0xb6   : > { %2741 = vmatmul.msk.f32.gmra.mxu2 %vm850_vm0, %v700_v23 }
  0xb7   : > { %2765 = vmatmul.msk.f32.gmra.mxu3 %vm850_vm0, %v708_v22 }
  0xbc   : > { %2694 = vmatmul.msk.f32.gmra.mxu0 %vm850_vm0, %v685_v28 }
  0xbd   : > { %2718 = vmatmul.msk.f32.gmra.mxu1 %vm850_vm0, %v693_v29 }
  0xbe   : > { %2742 = vmatmul.msk.f32.gmra.mxu2 %vm850_vm0, %v701_v31 }
  0xbf   : > { %2766 = vmatmul.msk.f32.gmra.mxu3 %vm850_vm0, %v709_v30 }
  0xc4   : > { %2695 = vmatmul.msk.f32.gmra.mxu0 %vm850_vm0, %v686_v36 }
  0xc5   : > { %2719 = vmatmul.msk.f32.gmra.mxu1 %vm850_vm0, %v694_v37 }
  0xc6   : > { %2743 = vmatmul.msk.f32.gmra.mxu2 %vm850_vm0, %v702_v39 }
  0xc7   : > { %2767 = vmatmul.msk.f32.gmra.mxu3 %vm850_vm0, %v710_v38 }
  0xcc   : > { %2696 = vmatmul.msk.f32.gmra.mxu0 %vm850_vm0, %v687_v44 }
  0xcd   : > { %2720 = vmatmul.msk.f32.gmra.mxu1 %vm850_vm0, %v695_v45 }
  0xce   : > { %2744 = vmatmul.msk.f32.gmra.mxu2 %vm850_vm0, %v703_v47  ;;  %v848_v47 = vld [vmem:[%s3689_s10 + $0x30] sm:$0xff] }
  0xcf   : > { %2768 = vmatmul.msk.f32.gmra.mxu3 %vm850_vm0, %v711_v46 }
  0xd4   : > { %2697 = vmatmul.msk.f32.gmra.mxu0 %vm850_vm0, %v688_v53 }
  0xd5   : > { %2721 = vmatmul.msk.f32.gmra.mxu1 %vm850_vm0, %v696_v52 }
  0xd6   : > { %2745 = vmatmul.msk.f32.gmra.mxu2 %vm850_vm0, %v704_v55 }
  0xd7   : > { %2769 = vmatmul.msk.f32.gmra.mxu3 %vm850_vm0, %v712_v54 }
  0xdc   : > { %2698 = vmatmul.msk.f32.gmra.mxu0 %vm850_vm0, %v689_v27 }
  0xdd   : > { %2722 = vmatmul.msk.f32.gmra.mxu1 %vm850_vm0, %v697_v59 }
  0xde   : > { %2746 = vmatmul.msk.f32.gmra.mxu2 %vm850_vm0, %v705_v60  ;;  %v3779_v60 = vld [vmem:[%s3689_s10 + $0x38] sm:$0xff]  ;;  %s3112_s10 = smov 64  }
  0xdf   : > { %2770 = vmatmul.msk.f32.gmra.mxu3 %vm850_vm0, %v713_v61 }
 0x121   : > { %v940_v63 = vpop.f32.mrf.mxu0 }
 0x122   : > { %v1053_v0 = vpop.f32.mrf.mxu1  ;;  %v3692_v1 = vadd.f32 %v940_v63, %v842_v62 }
 0x123   : > { %v3694_v2 = vadd.f32 %v1053_v0, %v842_v62 }
 0x124   : > { %1303 = vmax.xlane.f32.xlu2 %v3692_v1 }
 0x125   : > { %1319 = vmax.xlane.f32.xlu1 %v3694_v2 }
 0x129   : > { %v1166_v4 = vpop.f32.mrf.mxu2  ;;  %v943_v8 = vpop.f32.mrf.mxu0 }
 0x12a   : > { %v1279_v5 = vpop.f32.mrf.mxu3  ;;  %v3699_v6 = vadd.f32 %v1166_v4, %v842_v62  ;;  %v1056_v7 = vpop.f32.mrf.mxu1  ;;  %v3719_v21 = vadd.f32 %v943_v8, %v843_v3 }
 0x12b   : > { %v3701_v9 = vadd.f32 %v1056_v7, %v843_v3  ;;  %v3705_v10 = vadd.f32 %v1279_v5, %v842_v62 }
 0x12c   : > { %1335 = vmax.xlane.f32.xlu0 %v3699_v6 }
 0x12d   : > { %1321 = vmax.xlane.f32.xlu2 %v3701_v9 }
 0x131   : > { %v1169_v11 = vpop.f32.mrf.mxu2  ;;  %v946_v15 = vpop.f32.mrf.mxu0 }
 0x132   : > { %v1282_v12 = vpop.f32.mrf.mxu3  ;;  %v3707_v13 = vadd.f32 %v1169_v11, %v843_v3  ;;  %v1059_v16 = vpop.f32.mrf.mxu1  ;;  %v3715_v18 = vadd.f32 %v946_v15, %v844_v17 }
 0x133   : > { %v3709_v14 = vadd.f32 %v1282_v12, %v843_v3  ;;  %v3717_v19 = vadd.f32 %v1059_v16, %v844_v17 }
 0x134   : > { %1351 = vmax.xlane.f32.xlu0 %v3705_v10  ;;  %1337 = vmax.xlane.f32.xlu1 %v3707_v13 }
 0x135   : > { %1353 = vmax.xlane.f32.xlu2 %v3709_v14 }
 0x139   : > { %v949_v22 = vpop.f32.mrf.mxu0  ;;  %v1172_v24 = vpop.f32.mrf.mxu2 }
 0x13a   : > { %v1285_v20 = vpop.f32.mrf.mxu3  ;;  %v1062_v23 = vpop.f32.mrf.mxu1  ;;  %v3728_v29 = vadd.f32 %v1172_v24, %v844_v17  ;;  %v3737_v36 = vadd.f32 %v949_v22, %v845_v26 }
 0x13b   : > { %v3726_v28 = vadd.f32 %v1285_v20, %v844_v17  ;;  %v3731_v30 = vadd.f32 %v1062_v23, %v845_v26 }
 0x13c   : > { %1307 = vmax.xlane.f32.xlu1 %v3715_v18  ;;  %1305 = vmax.xlane.f32.xlu0 %v3719_v21 }
 0x13d   : > { %1323 = vmax.xlane.f32.xlu2 %v3717_v19 }
 0x141   : > { %v952_v32 = vpop.f32.mrf.mxu0  ;;  %v1175_v35 = vpop.f32.mrf.mxu2 }
 0x142   : > { %v1288_v31 = vpop.f32.mrf.mxu3  ;;  %v1065_v34 = vpop.f32.mrf.mxu1  ;;  %v3747_v42 = vadd.f32 %v952_v32, %v846_v33  ;;  %v3749_v43 = vadd.f32 %v1175_v35, %v845_v26 }
 0x143   : > { %v3739_v37 = vadd.f32 %v1288_v31, %v845_v26  ;;  %v3741_v38 = vadd.f32 %v1065_v34, %v846_v33 }
 0x144   : > { %1355 = vmax.xlane.f32.xlu1 %v3726_v28  ;;  %1339 = vmax.xlane.f32.xlu0 %v3728_v29 }
 0x145   : > { %1325 = vmax.xlane.f32.xlu2 %v3731_v30 }
 0x149   : > { %v955_v41 = vpop.f32.mrf.mxu0  ;;  %v1178_v46 = vpop.f32.mrf.mxu2 }
 0x14a   : > { %v1291_v39 = vpop.f32.mrf.mxu3  ;;  %v3751_v44 = vadd.f32 %v955_v41, %v847_v40  ;;  %v3759_v49 = vadd.f32 %v1178_v46, %v846_v33  ;;  %v1068_v51 = vpop.f32.mrf.mxu1 }
 0x14b   : > { %v3757_v48 = vadd.f32 %v1291_v39, %v846_v33  ;;  %v3768_v55 = vadd.f32 %v1068_v51, %v847_v40 }
 0x14c   : > { %1357 = vmax.xlane.f32.xlu1 %v3739_v37  ;;  %1309 = vmax.xlane.f32.xlu0 %v3737_v36 }
 0x14d   : > { %1327 = vmax.xlane.f32.xlu2 %v3741_v38 }
 0x151   : > { %v1181_v53 = vpop.f32.mrf.mxu2  ;;  %v958_v0 = vpop.f32.mrf.mxu0 }
 0x152   : > { %v1294_v45 = vpop.f32.mrf.mxu3  ;;  %v1071_v56 = vpop.f32.mrf.mxu1  ;;  %v3774_v59 = vadd.f32 %v1181_v53, %v847_v40  ;;  %v3788_v4 = vadd.f32 %v958_v0, %v848_v47 }
 0x153   : > { %v3766_v54 = vadd.f32 %v1294_v45, %v847_v40  ;;  %v3784_v63 = vadd.f32 %v1071_v56, %v848_v47 }
 0x154   : > { %1311 = vmax.xlane.f32.xlu1 %v3747_v42  ;;  %1341 = vmax.xlane.f32.xlu0 %v3749_v43 }
 0x155   : > { %1313 = vmax.xlane.f32.xlu2 %v3751_v44 }
 0x159   : > { %v1184_v57 = vpop.f32.mrf.mxu2 }
 0x15a   : > { %v1297_v50 = vpop.f32.mrf.mxu3  ;;  %v3772_v58 = vadd.f32 %v1184_v57, %v848_v47  ;;  %v1074_v61 = vpop.f32.mrf.mxu1 }
 0x15b   : > { %v3761_v52 = vadd.f32 %v1297_v50, %v848_v47  ;;  %v3782_v62 = vadd.f32 %v1074_v61, %v3779_v60 }
 0x15c   : > { %1359 = vmax.xlane.f32.xlu1 %v3757_v48  ;;  %1343 = vmax.xlane.f32.xlu0 %v3759_v49 }
 0x15d   : > { %1363 = vmax.xlane.f32.xlu2 %v3761_v52 }
 0x161   : > { %v1187_v3 = vpop.f32.mrf.mxu2 }
 0x162   : > { %v3791_v5 = vadd.f32 %v1187_v3, %v3779_v60  ;;  %v1300_v7 = vpop.f32.mrf.mxu3 }
 0x163   : > { %v3796_v8 = vadd.f32 %v1300_v7, %v3779_v60 }
 0x164   : > { %1361 = vmax.xlane.f32.xlu1 %v3766_v54  ;;  %1329 = vmax.xlane.f32.xlu0 %v3768_v55 }
 0x16c   : > { %1347 = vmax.xlane.f32.xlu1 %v3772_v58  ;;  %1345 = vmax.xlane.f32.xlu0 %v3774_v59 }
 0x174   : > { %1333 = vmax.xlane.f32.xlu1 %v3782_v62  ;;  %1331 = vmax.xlane.f32.xlu0 %v3784_v63 }
 0x17c   : > { %1349 = vmax.xlane.f32.xlu1 %v3791_v5  ;;  %1315 = vmax.xlane.f32.xlu0 %v3788_v4 }
 0x184   : > { %1365 = vmax.xlane.f32.xlu0 %v3796_v8 }
 0x197   : > { %v3799_v12 = vpop.xlane.xlu2 %1303 }
 0x198   : > { %v1320_v11 = vpop.xlane.xlu1 %1319 }
 0x199   : > { %v1375_v15 = vsub.f32 %v3694_v2, %v1320_v11 }
 0x19b   : > { %v1415_v16 = vmul.f32 1.442695, %v1375_v15 }
 0x19d   : > { %2903 = vpow2.f32 %v1415_v16 }
 0x19f   : > { %v1336_v17 = vpop.xlane.xlu0 %1335 }
 0x1a0   : > { %v1383_v20 = vsub.f32 %v3699_v6, %v1336_v17  ;;  %v1322_v22 = vpop.xlane.xlu2 %1321 }
 0x1a1   : > { %v1376_v6 = vsub.f32 %v3701_v9, %v1322_v22 }
 0x1a2   : > { %v1431_v23 = vmul.f32 1.442695, %v1383_v20 }
 0x1a3   : > { %v3803_v24 = vpop.eup %2903  ;;  %v1417_v40 = vmul.f32 1.442695, %v1376_v6 }
 0x1a4   : > { %2905 = vpow2.f32 %v1431_v23  ;;  %1479 = vadd.xlane.f32.xlu2 %v3803_v24 }
 0x1a7   : > { %v1352_v25 = vpop.xlane.xlu0 %1351  ;;  %v1338_v26 = vpop.xlane.xlu1 %1337 }
 0x1a8   : > { %v1391_v27 = vsub.f32 %v3705_v10, %v1352_v25  ;;  %v1354_v31 = vpop.xlane.xlu2 %1353  ;;  %v1384_v9 = vsub.f32 %v3707_v13, %v1338_v26 }
 0x1a9   : > { %v1392_v32 = vsub.f32 %v3709_v14, %v1354_v31 }
 0x1aa   : > { %v3808_v2 = vpop.eup %2905  ;;  %v1447_v33 = vmul.f32 1.442695, %v1391_v27  ;;  %v1433_v51 = vmul.f32 1.442695, %v1384_v9 }
 0x1ab   : > { %v1449_v34 = vmul.f32 1.442695, %v1392_v32  ;;  %1495 = vadd.xlane.f32.xlu1 %v3808_v2 }
 0x1ac   : > { %2907 = vpow2.f32 %v1447_v33 }
 0x1ad   : > { %2909 = vpow2.f32 %v1449_v34 }
 0x1ae   : > { %2911 = vpow2.f32 %v1417_v40 }
 0x1af   : > { %v3812_v35 = vpop.xlane.xlu1 %1307  ;;  %v3814_v39 = vpop.xlane.xlu0 %1305 }
 0x1b0   : > { %v1324_v41 = vpop.xlane.xlu2 %1323 }
 0x1b1   : > { %v1377_v10 = vsub.f32 %v3717_v19, %v1324_v41 }
 0x1b2   : > { %v3817_v45 = vpop.eup %2907 }
 0x1b3   : > { %v1419_v14 = vmul.f32 1.442695, %v1377_v10  ;;  %1511 = vadd.xlane.f32.xlu2 %v3817_v45  ;;  %v3820_v46 = vpop.eup %2909 }
 0x1b4   : > { %1513 = vadd.xlane.f32.xlu0 %v3820_v46  ;;  %v3825_v56 = vpop.eup %2911 }
 0x1b5   : > { %2913 = vpow2.f32 %v1419_v14 }
 0x1b6   : > { %2915 = vpow2.f32 %v1433_v51 }
 0x1b7   : > { %v1356_v47 = vpop.xlane.xlu1 %1355  ;;  %v1340_v50 = vpop.xlane.xlu0 %1339 }
 0x1b8   : > { %v1385_v53 = vsub.f32 %v3728_v29, %v1340_v50  ;;  %v1326_v57 = vpop.xlane.xlu2 %1325  ;;  %v1393_v61 = vsub.f32 %v3726_v28, %v1356_v47 }
 0x1b9   : > { %v1378_v13 = vsub.f32 %v3731_v30, %v1326_v57 }
 0x1ba   : > { %v1435_v19 = vmul.f32 1.442695, %v1385_v53  ;;  %v1451_v3 = vmul.f32 1.442695, %v1393_v61 }
 0x1bb   : > { %1481 = vadd.xlane.f32.xlu2 %v3825_v56  ;;  %v3829_v0 = vpop.eup %2913  ;;  %v1421_v15 = vmul.f32 1.442695, %v1378_v13 }
 0x1bc   : > { %2917 = vpow2.f32 %v1435_v19  ;;  %1483 = vadd.xlane.f32.xlu0 %v3829_v0  ;;  %v3836_v16 = vpop.eup %2915 }
 0x1bd   : > { %2919 = vpow2.f32 %v1451_v3 }
 0x1bf   : > { %v1358_v7 = vpop.xlane.xlu1 %1357  ;;  %v3833_v11 = vpop.xlane.xlu0 %1309 }
 0x1c0   : > { %v1394_v29 = vsub.f32 %v3739_v37, %v1358_v7  ;;  %v1328_v22 = vpop.xlane.xlu2 %1327 }
 0x1c1   : > { %v1379_v31 = vsub.f32 %v3741_v38, %v1328_v22  ;;  %v1367_v38 = vsub.f32 %v3692_v1, %v3799_v12  ;;  %v961_v12 = vpop.f32.mrf.mxu0 }
 0x1c2   : > { %v1453_v28 = vmul.f32 1.442695, %v1394_v29  ;;  %v3838_v17 = vpop.eup %2917  ;;  %v3878_v7 = vadd.f32 %v961_v12, %v3779_v60 }
 0x1c3   : > { %1497 = vadd.xlane.f32.xlu2 %v3836_v16  ;;  %1499 = vadd.xlane.f32.xlu1 %v3838_v17  ;;  %v3845_v37 = vpop.eup %2919  ;;  %v1423_v32 = vmul.f32 1.442695, %v1379_v31  ;;  %v1399_v50 = vmul.f32 1.442695, %v1367_v38 }
 0x1c4   : > { %2921 = vpow2.f32 %v1453_v28 }
 0x1c5   : > { %2923 = vpow2.f32 %v1421_v15 }
 0x1c7   : > { %v3842_v30 = vpop.xlane.xlu1 %1311  ;;  %v1342_v20 = vpop.xlane.xlu0 %1341 }
 0x1c8   : > { %v1386_v23 = vsub.f32 %v3749_v43, %v1342_v20  ;;  %v3862_v14 = vpop.xlane.xlu2 %1313 }
 0x1ca   : > { %v3847_v25 = vpop.eup %2921  ;;  %v1437_v26 = vmul.f32 1.442695, %v1386_v23 }
 0x1cb   : > { %v3849_v27 = vpop.eup %2923  ;;  %1515 = vadd.xlane.f32.xlu2 %v3845_v37  ;;  %1517 = vadd.xlane.f32.xlu0 %v3847_v25 }
 0x1cc   : > { %1485 = vadd.xlane.f32.xlu1 %v3849_v27  ;;  %2925 = vpow2.f32 %v1437_v26 }
 0x1cd   : > { %2927 = vpow2.f32 %v1423_v32 }
 0x1cf   : > { %v1360_v33 = vpop.xlane.xlu1 %1359  ;;  %v1344_v34 = vpop.xlane.xlu0 %1343 }
 0x1d0   : > { %v1395_v43 = vsub.f32 %v3757_v48, %v1360_v33  ;;  %v1387_v6 = vsub.f32 %v3759_v49, %v1344_v34  ;;  %v1364_v3 = vpop.xlane.xlu2 %1363 }
 0x1d2   : > { %v1455_v40 = vmul.f32 1.442695, %v1395_v43  ;;  %v1439_v41 = vmul.f32 1.442695, %v1387_v6  ;;  %v3857_v10 = vpop.eup %2925  ;;  %v807_v43 = vld [vmem:[%s5091_s2 + $0xe8] sm:$0xff] }
 0x1d3   : > { %1501 = vadd.xlane.f32.xlu2 %v3857_v10  ;;  %v3865_v49 = vpop.eup %2927 }
 0x1d4   : > { %2929 = vpow2.f32 %v1455_v40 }
 0x1d5   : > { %2931 = vpow2.f32 %v1439_v41 }
 0x1d6   : > { %2933 = vpow2.f32 %v1399_v50  ;;  %v806_v50 = vld [vmem:[%s5091_s2 + $0xe0] sm:$0xff] }
 0x1d7   : > { %v1362_v9 = vpop.xlane.xlu1 %1361  ;;  %v1330_v47 = vpop.xlane.xlu0 %1329 }
 0x1d8   : > { %v1380_v48 = vsub.f32 %v3768_v55, %v1330_v47  ;;  %v1396_v1 = vsub.f32 %v3766_v54, %v1362_v9  ;;  %v1397_v54 = vsub.f32 %v3761_v52, %v1364_v3  ;;  %v1371_v47 = vsub.f32 %v3747_v42, %v3842_v30  ;;  %v805_v42 = vld [vmem:[%s5091_s2 + $0xd8] sm:$0xff] }
 0x1da   : > { %v3867_v51 = vpop.eup %2929  ;;  %v1425_v53 = vmul.f32 1.442695, %v1380_v48  ;;  %v1457_v15 = vmul.f32 1.442695, %v1396_v1  ;;  %v1459_v23 = vmul.f32 1.442695, %v1397_v54 }
 0x1db   : > { %v3869_v19 = vpop.eup %2931  ;;  %1519 = vadd.xlane.f32.xlu1 %v3867_v51  ;;  %1487 = vadd.xlane.f32.xlu2 %v3865_v49  ;;  %v825_v48 = vld [vmem:[%s5091_s2 + $0x178] sm:$0xff]  ;;  %v824_v1 = vld [vmem:[%s5091_s2 + $0x170] sm:$0xff]  ;;  %v1407_v12 = vmul.f32 1.442695, %v1371_v47  ;;  %v822_v54 = vld [vmem:[%s5091_s2 + $0x160] sm:$0xff] }
 0x1dc   : > { %1503 = vadd.xlane.f32.xlu0 %v3869_v19  ;;  %2935 = vpow2.f32 %v1425_v53  ;;  %v3880_v29 = vpop.eup %2933  ;;  %2281 = vmatpush.msrb.mxu2 %v825_v48  ;;  %v836_v48 = vld [vmem:[%s5091_s2 + $0x1d0] sm:$0xff] }
 0x1de   : > { %2282 = vmatpush.msrb.mxu2 %v824_v1  ;;  %v835_v1 = vld [vmem:[%s5091_s2 + $0x1c8] sm:$0xff] }
 0x1df   : > { %v1348_v57 = vpop.xlane.xlu1 %1347  ;;  %v1346_v55 = vpop.xlane.xlu0 %1345 }
 0x1e0   : > { %v1389_v61 = vsub.f32 %v3772_v58, %v1348_v57  ;;  %v1388_v13 = vsub.f32 %v3774_v59, %v1346_v55  ;;  %v1368_v58 = vsub.f32 %v3719_v21, %v3814_v39  ;;  %v809_v21 = vld [vmem:[%s5091_s2 + $0xf8] sm:$0xff]  ;;  %v1369_v39 = vsub.f32 %v3715_v18, %v3812_v35 }
 0x1e1   : > { %2240 = vmatpush.msrb.mxu1 %v809_v21  ;;  %v800_v21 = vld [vmem:[%s5091_s2 + $0xb0] sm:$0xff] }
 0x1e2   : > { %v1443_v28 = vmul.f32 1.442695, %v1389_v61  ;;  %v1441_v20 = vmul.f32 1.442695, %v1388_v13  ;;  %v3882_v22 = vpop.eup %2935  ;;  %v1401_v52 = vmul.f32 1.442695, %v1368_v58  ;;  %v1372_v58 = vsub.f32 %v3751_v44, %v3862_v14 }
 0x1e3   : > { %1489 = vadd.xlane.f32.xlu1 %v3882_v22  ;;  %1317 = vmax.xlane.f32.xlu2 %v3878_v7  ;;  %v1403_v38 = vmul.f32 1.442695, %v1369_v39  ;;  %v801_v44 = vld [vmem:[%s5091_s2 + $0xb8] sm:$0xff]  ;;  %v820_v14 = vld [vmem:[%s5091_s2 + $0x150] sm:$0xff] }
 0x1e4   : > { %2937 = vpow2.f32 %v1443_v28  ;;  %1463 = vadd.xlane.f32.xlu0 %v3880_v29 }
 0x1e5   : > { %2939 = vpow2.f32 %v1441_v20  ;;  %v803_v20 = vld [vmem:[%s5091_s2 + $0xc8] sm:$0xff] }
 0x1e6   : > { %2941 = vpow2.f32 %v1457_v15  ;;  %v823_v15 = vld [vmem:[%s5091_s2 + $0x168] sm:$0xff] }
 0x1e7   : > { %v1334_v59 = vpop.xlane.xlu1 %1333  ;;  %v1332_v60 = vpop.xlane.xlu0 %1331  ;;  %2943 = vpow2.f32 %v1459_v23  ;;  %2283 = vmatpush.msrb.mxu2 %v823_v15  ;;  %v833_v15 = vld [vmem:[%s5091_s2 + $0x1b8] sm:$0xff] }
 0x1e8   : > { %v1381_v26 = vsub.f32 %v3784_v63, %v1332_v60  ;;  %v808_v63 = vld [vmem:[%s5091_s2 + $0xf0] sm:$0xff]  ;;  %v1382_v30 = vsub.f32 %v3782_v62, %v1334_v59 }
 0x1e9   : > { %2241 = vmatpush.msrb.mxu1 %v808_v63  ;;  %v804_v62 = vld [vmem:[%s5091_s2 + $0xd0] sm:$0xff]  ;;  %2284 = vmatpush.msrb.mxu2 %v822_v54  ;;  %v819_v63 = vld [vmem:[%s5091_s2 + $0x148] sm:$0xff] }
 0x1ea   : > { %v3891_v31 = vpop.eup %2937  ;;  %v1427_v32 = vmul.f32 1.442695, %v1381_v26  ;;  %v1429_v61 = vmul.f32 1.442695, %v1382_v30  ;;  %v840_v60 = vld [vmem:[%s5091_s2 + $0x1f0] sm:$0xff] }
 0x1eb   : > { %v3893_v33 = vpop.eup %2939  ;;  %2242 = vmatpush.msrb.mxu1 %v807_v43  ;;  %v1409_v26 = vmul.f32 1.442695, %v1372_v58  ;;  %v796_v30 = vld [vmem:[%s5091_s2 + $0x90] sm:$0xff] }
 0x1ec   : > { %v3895_v34 = vpop.eup %2941  ;;  %1507 = vadd.xlane.f32.xlu0 %v3891_v31  ;;  %1505 = vadd.xlane.f32.xlu1 %v3893_v33  ;;  %2945 = vpow2.f32 %v1427_v32  ;;  %v839_v32 = vld [vmem:[%s5091_s2 + $0x1e8] sm:$0xff]  ;;  %v812_v54 = vld [vmem:[%s5091_s2 + $0x110] sm:$0xff] }
 0x1ed   : > { %1521 = vadd.xlane.f32.xlu2 %v3895_v34  ;;  %2947 = vpow2.f32 %v1401_v52  ;;  %v3914_v9 = vpop.eup %2943  ;;  %2243 = vmatpush.msrb.mxu1 %v806_v50  ;;  %v797_v50 = vld [vmem:[%s5091_s2 + $0x98] sm:$0xff] }
 0x1ef   : > { %v1350_v6 = vpop.xlane.xlu1 %1349  ;;  %v3911_v40 = vpop.xlane.xlu0 %1315  ;;  %2244 = vmatpush.msrb.mxu1 %v805_v42 }
 0x1f0   : > { %v1390_v41 = vsub.f32 %v3791_v5, %v1350_v6  ;;  %v841_v5 = vld [vmem:[%s5091_s2 + $0x1f8] sm:$0xff]  ;;  %v1373_v43 = vsub.f32 %v3788_v4, %v3911_v40  ;;  %v838_v6 = vld [vmem:[%s5091_s2 + $0x1e0] sm:$0xff] }
 0x1f1   : > { %2322 = vmatpush.msrb.mxu3 %v841_v5  ;;  %2245 = vmatpush.msrb.mxu1 %v804_v62  ;;  %v798_v4 = vld [vmem:[%s5091_s2 + $0xa0] sm:$0xff]  ;;  %v817_v40 = vld [vmem:[%s5091_s2 + $0x138] sm:$0xff]  ;;  %v816_v5 = vld [vmem:[%s5091_s2 + $0x130] sm:$0xff] }
 0x1f2   : > { %v1445_v18 = vmul.f32 1.442695, %v1390_v41  ;;  %v3916_v35 = vpop.eup %2945  ;;  %v799_v41 = vld [vmem:[%s5091_s2 + $0xa8] sm:$0xff]  ;;  %v1411_v47 = vmul.f32 1.442695, %v1373_v43  ;;  %v794_v62 = vld [vmem:[%s5091_s2 + $0x80] sm:$0xff] }
 0x1f3   : > { %v3929_v53 = vpop.eup %2947  ;;  %2246 = vmatpush.msrb.mxu1 %v803_v20  ;;  %2323 = vmatpush.msrb.mxu3 %v840_v60  ;;  %v832_v20 = vld [vmem:[%s5091_s2 + $0x1b0] sm:$0xff]  ;;  %v810_v60 = vld [vmem:[%s5091_s2 + $0x100] sm:$0xff] }
 0x1f4   : > { %2949 = vpow2.f32 %v1445_v18  ;;  %1491 = vadd.xlane.f32.xlu0 %v3916_v35  ;;  %1523 = vadd.xlane.f32.xlu1 %v3914_v9  ;;  %v837_v18 = vld [vmem:[%s5091_s2 + $0x1d8] sm:$0xff] }
 0x1f5   : > { %2951 = vpow2.f32 %v1403_v38  ;;  %1465 = vadd.xlane.f32.xlu2 %v3929_v53  ;;  %2324 = vmatpush.msrb.mxu3 %v839_v32  ;;  %v818_v38 = vld [vmem:[%s5091_s2 + $0x140] sm:$0xff]  ;;  %v827_v32 = vld [vmem:[%s5091_s2 + $0x188] sm:$0xff] }
 0x1f6   : > { %2953 = vpow2.f32 %v1407_v12 }
 0x1f7   : > { %v1366_v57 = vpop.xlane.xlu0 %1365  ;;  %2325 = vmatpush.msrb.mxu3 %v838_v6 }
 0x1f8   : > { %v1398_v55 = vsub.f32 %v3796_v8, %v1366_v57  ;;  %v1370_v8 = vsub.f32 %v3737_v36, %v3833_v11  ;;  %v802_v36 = vld [vmem:[%s5091_s2 + $0xc0] sm:$0xff]  ;;  %v821_v11 = vld [vmem:[%s5091_s2 + $0x158] sm:$0xff]  ;;  %v815_v57 = vld [vmem:[%s5091_s2 + $0x128] sm:$0xff] }
 0x1f9   : > { %2247 = vmatpush.msrb.mxu1 %v802_v36  ;;  %2285 = vmatpush.msrb.mxu2 %v821_v11  ;;  %v831_v36 = vld [vmem:[%s5091_s2 + $0x1a8] sm:$0xff] }
 0x1fa   : > { %v3942_v13 = vpop.eup %2949  ;;  %v1461_v3 = vmul.f32 1.442695, %v1398_v55  ;;  %v1405_v59 = vmul.f32 1.442695, %v1370_v8  ;;  %2326 = vmatpush.msrb.mxu3 %v837_v18  ;;  %v795_v55 = vld [vmem:[%s5091_s2 + $0x88] sm:$0xff]  ;;  %v813_v8 = vld [vmem:[%s5091_s2 + $0x118] sm:$0xff] }
 0x1fb   : > { %v3950_v28 = vpop.eup %2951  ;;  %2248 = vmatpush.msrb.mxu1 %v801_v44  ;;  %2286 = vmatpush.msrb.mxu2 %v820_v14  ;;  %v811_v11 = vld [vmem:[%s5091_s2 + $0x108] sm:$0xff]  ;;  %v829_v44 = vld [vmem:[%s5091_s2 + $0x198] sm:$0xff]  ;;  %v2015_v18 = vld [vmem:[%s4094_s17 + $0x40] sm:$0xff] }
 0x1fc   : > { %2955 = vpow2.f32 %v1461_v3  ;;  %1467 = vadd.xlane.f32.xlu0 %v3950_v28  ;;  %1509 = vadd.xlane.f32.xlu1 %v3942_v13  ;;  %v3979_v23 = vpop.eup %2953  ;;  %v814_v3 = vld [vmem:[%s5091_s2 + $0x120] sm:$0xff] }
 0x1fd   : > { %2957 = vpow2.f32 %v1429_v61  ;;  %2249 = vmatpush.msrb.mxu1 %v800_v21  ;;  %2287 = vmatpush.msrb.mxu2 %v819_v63  ;;  %v834_v61 = vld [vmem:[%s5091_s2 + $0x1c0] sm:$0xff] }
 0x1fe   : > { %2959 = vpow2.f32 %v1405_v59  ;;  %2327 = vmatpush.msrb.mxu3 %v836_v48  ;;  %v830_v59 = vld [vmem:[%s5091_s2 + $0x1a0] sm:$0xff] }
 0x1ff   : > { %2961 = vpow2.f32 %v1409_v26  ;;  %2250 = vmatpush.msrb.mxu1 %v799_v41  ;;  %2288 = vmatpush.msrb.mxu2 %v818_v38  ;;  %v828_v26 = vld [vmem:[%s5091_s2 + $0x190] sm:$0xff]  ;;  %v826_v21 = vld [vmem:[%s5091_s2 + $0x180] sm:$0xff] }
 0x200   : > { %2963 = vpow2.f32 %v1411_v47  ;;  %2328 = vmatpush.msrb.mxu3 %v835_v1 }
 0x201   : > { %2251 = vmatpush.msrb.mxu1 %v798_v4  ;;  %2289 = vmatpush.msrb.mxu2 %v817_v40 }
 0x202   : > { %v3981_v52 = vpop.eup %2955  ;;  %2329 = vmatpush.msrb.mxu3 %v834_v61 }
 0x203   : > { %v3992_v39 = vpop.eup %2957  ;;  %1525 = vadd.xlane.f32.xlu2 %v3981_v52  ;;  %2252 = vmatpush.msrb.mxu1 %v797_v50 }
 0x204   : > { %1471 = vadd.xlane.f32.xlu0 %v3979_v23  ;;  %1493 = vadd.xlane.f32.xlu1 %v3992_v39  ;;  %v4026_v42 = vpop.eup %2959 }
 0x205   : > { %v4034_v12 = vpop.eup %2961  ;;  %2290 = vmatpush.msrb.mxu2 %v816_v5  ;;  %2253 = vmatpush.msrb.mxu1 %v796_v30 }
 0x206   : > { %2330 = vmatpush.msrb.mxu3 %v833_v15  ;;  %v4065_v58 = vpop.eup %2963 }
 0x207   : > { %2291 = vmatpush.msrb.mxu2 %v815_v57  ;;  %2254 = vmatpush.msrb.mxu1 %v795_v55  ;;  %v2779_v57 = vxor.u32 2147483648, %v2015_v18  ;;  %v2031_v18 = vld [vmem:[%s4094_s17 + $0xc0] sm:$0xff] }
 0x208   : > { %2331 = vmatpush.msrb.mxu3 %v832_v20 }
 0x209   : > { %2292 = vmatpush.msrb.mxu2 %v814_v3  ;;  %2255 = vmatpush.msrb.mxu1 %v794_v62  ;;  %vm2065_vm6 = vcmp.ge.s32.totalorder %v2779_v57, 2576980378 }
 0x20a   : > { %2332 = vmatpush.msrb.mxu3 %v831_v36 }
 0x20b   : > { %1469 = vadd.xlane.f32.xlu2 %v4026_v42  ;;  %2293 = vmatpush.msrb.mxu2 %v813_v8 }
 0x20c   : > { %1473 = vadd.xlane.f32.xlu1 %v4034_v12  ;;  %2333 = vmatpush.msrb.mxu3 %v830_v59 }
 0x20d   : > { %2294 = vmatpush.msrb.mxu2 %v812_v54 }
 0x20e   : > { %2334 = vmatpush.msrb.mxu3 %v829_v44 }
 0x20f   : > { %2295 = vmatpush.msrb.mxu2 %v811_v11  ;;  %v2023_v11 = vld [vmem:[%s4094_s17 + $0x80] sm:$0xff] }
 0x210   : > { %2335 = vmatpush.msrb.mxu3 %v828_v26 }
 0x211   : > { %2296 = vmatpush.msrb.mxu2 %v810_v60 }
 0x212   : > { %2336 = vmatpush.msrb.mxu3 %v827_v32 }
 0x213   : > { %1475 = vadd.xlane.f32.xlu2 %v4065_v58 }
 0x214   : > { %2337 = vmatpush.msrb.mxu3 %v826_v21  ;;  %v2787_v21 = vxor.u32 2147483648, %v2023_v11 }
 0x216   : > { %vm2089_vm11 = vcmp.ge.s32.totalorder %v2787_v21, 2576980378 }
 0x217   : > { %v1480_v14 = vpop.xlane.xlu2 %1479 }
 0x218   : > { %2965 = vrcp.f32 %v1480_v14  ;;  %v1658_v38 = vand.u32 2147483648, %v1480_v14  ;;  %v1656_v40 = vand.u32 2147483647, %v1480_v14  ;;  %vm1652_vm2 = vweird.f32 %v1480_v14 }
 0x21a   : > { %v1659_v48 = vor.u32 1.1754944e-38, %v1658_v38  ;;  %vm1657_vm4 = vcmp.eq.f32.partialorder %v1656_v40, 8.507059e+37 }
 0x21e   : > { %v2966_v63 = vpop.eup %2965  ;;  %v1496_v43 = vpop.xlane.xlu1 %1495 }
 0x21f   : > { %v1648_v6 = vmul.f32 %v2966_v63, %v1480_v14  ;;  %2967 = vrcp.f32 %v1496_v43  ;;  %vm1653_vm1 = vweird.f32 %v2966_v63  ;;  %v1778_v15 = vand.u32 2147483648, %v1496_v43 }
 0x220   : > { %vm1654_vm3 = vmor %vm1652_vm2, %vm1653_vm1  ;;  %v1776_v20 = vand.u32 2147483647, %v1496_v43  ;;  %vm1772_vm7 = vweird.f32 %v1496_v43 }
 0x221   : > { %v1649_v41 = vsub.f32 1.0, %v1648_v6  ;;  %v1779_v44 = vor.u32 1.1754944e-38, %v1778_v15 }
 0x222   : > { %vm1777_vm9 = vcmp.eq.f32.partialorder %v1776_v20, 8.507059e+37 }
 0x223   : > { %v1650_v4 = vmul.f32 %v2966_v63, %v1649_v41 }
 0x225   : > { %v2968_v47 = vpop.eup %2967  ;;  %v1651_v50 = vadd.f32 %v2966_v63, %v1650_v4 }
 0x226   : > { %v1768_v5 = vmul.f32 %v2968_v47, %v1496_v43  ;;  %v4097_v30 = vpop.xlane.xlu2 %1511  ;;  %vm1773_vm5 = vweird.f32 %v2968_v47 }
 0x227   : > { %v1655_v1 = vsel %vm1654_vm3, %v2966_v63, %v1651_v50  ;;  %2969 = vrcp.f32 %v4097_v30  ;;  %v4100_v61 = vpop.xlane.xlu0 %1513  ;;  %vm1774_vm8 = vmor %vm1772_vm7, %vm1773_vm5  ;;  %v1898_v38 = vand.u32 2147483648, %v4097_v30  ;;  %v793_v50 = vld [vmem:[%s5091_s2 + $0x78] sm:$0xff]  ;;  %vm1892_vm12 = vweird.f32 %v4097_v30 }
 0x228   : > { %v1769_v55 = vsub.f32 1.0, %v1768_v5  ;;  %v1660_v3 = vsel %vm1657_vm4, %v1659_v48, %v1655_v1  ;;  %2971 = vrcp.f32 %v4100_v61  ;;  %2199 = vmatpush.msrb.mxu0 %v793_v50  ;;  %v1913_v21 = vand.u32 2147483648, %v4100_v61 }
 0x229   : > { %v1661_v8 = vmul.f32 1.1111112, %v1660_v3  ;;  %v2795_v3 = vxor.u32 2147483648, %v2031_v18  ;;  %v1899_v15 = vor.u32 1.1754944e-38, %v1898_v38  ;;  %vm1907_vm1 = vweird.f32 %v4100_v61  ;;  %v790_v18 = vld [vmem:[%s5091_s2 + $0x60] sm:$0xff] }
 0x22a   : > { %v1770_v62 = vmul.f32 %v2968_v47, %v1769_v55  ;;  %v1896_v55 = vand.u32 2147483647, %v4097_v30 }
 0x22b   : > { %v2143_v36 = vmul.f32 %v3803_v24, %v1661_v8  ;;  %v1911_v8 = vand.u32 2147483647, %v4100_v61  ;;  %vm4167_vm3 = vcmp.ge.s32.totalorder %v2795_v3, 2576980378  ;;  %v789_v3 = vld [vmem:[%s5091_s2 + $0x58] sm:$0xff] }
 0x22c   : > { %v1771_v54 = vadd.f32 %v2968_v47, %v1770_v62  ;;  %vm1897_vm15 = vcmp.eq.f32.partialorder %v1896_v55, 8.507059e+37  ;;  %v785_v62 = vld [vmem:[%s5091_s2 + $0x38] sm:$0xff] }
 0x22d   : > { %v2970_v59 = vpop.eup %2969  ;;  %2811 = vmatmul.msk.f32.vlgmr.msrb.gmra.mxu1 %vm2065_vm6, %v2143_v36  ;;  %v792_v36 = vld [vmem:[%s5091_s2 + $0x70] sm:$0xff]  ;;  %vm4175_vm4 = vcmp.eq.f32.partialorder %v1911_v8, 8.507059e+37 }
 0x22e   : > { %v1775_v60 = vsel %vm1774_vm8, %v2968_v47, %v1771_v54  ;;  %v1888_v14 = vmul.f32 %v2970_v59, %v4097_v30  ;;  %v4106_v26 = vpop.xlane.xlu2 %1481  ;;  %v4108_v32 = vpop.eup %2971  ;;  %vm1893_vm10 = vweird.f32 %v2970_v59  ;;  %v2032_v47 = vld [vmem:[%s4094_s17 + $0xc8] sm:$0xff]  ;;  %2200 = vmatpush.msrb.mxu0 %v792_v36 }
 0x22f   : > { %2973 = vrcp.f32 %v4106_v26  ;;  %v1903_v24 = vmul.f32 %v4108_v32, %v4100_v61  ;;  %v4113_v43 = vpop.xlane.xlu0 %1483  ;;  %v1780_v6 = vsel %vm1777_vm9, %v1779_v44, %v1775_v60  ;;  %vm4128_vm13 = vmor %vm1892_vm12, %vm1893_vm10  ;;  %v2796_v54 = vxor.u32 2147483648, %v2032_v47  ;;  %v2016_v44 = vld [vmem:[%s4094_s17 + $0x48] sm:$0xff] }
 0x230   : > { %v1889_v63 = vsub.f32 1.0, %v1888_v14  ;;  %2975 = vrcp.f32 %v4113_v43  ;;  %v1781_v40 = vmul.f32 1.1111112, %v1780_v6  ;;  %vm1908_vm14 = vweird.f32 %v4108_v32 }
 0x231   : > { %v1904_v4 = vsub.f32 1.0, %v1903_v24  ;;  %vm4158_vm2 = vmor %vm1907_vm1, %vm1908_vm14  ;;  %v1673_v38 = vand.u32 2147483648, %v4106_v26  ;;  %vm4179_vm5 = vcmp.ge.s32.totalorder %v2796_v54, 2576980378  ;;  %vm1667_vm7 = vweird.f32 %v4106_v26 }
 0x232   : > { %v1890_v41 = vmul.f32 %v2970_v59, %v1889_v63  ;;  %v2151_v1 = vmul.f32 %v3808_v2, %v1781_v40  ;;  %v2780_v40 = vxor.u32 2147483648, %v2016_v44  ;;  %vm1682_vm9 = vweird.f32 %v4113_v43 }
 0x233   : > { %v1905_v5 = vmul.f32 %v4108_v32, %v1904_v4  ;;  %v1674_v36 = vor.u32 1.1754944e-38, %v1673_v38 }
 0x234   : > { %v1891_v48 = vadd.f32 %v2970_v59, %v1890_v41  ;;  %2819 = vmatmul.msk.f32.vlgmr.msrb.gmra.mxu2 %vm2089_vm11, %v2151_v1  ;;  %vm4201_vm8 = vcmp.ge.s32.totalorder %v2780_v40, 2576980378  ;;  %v2024_v40 = vld [vmem:[%s4094_s17 + $0x88] sm:$0xff] }
 0x235   : > { %v4124_v57 = vpop.eup %2973  ;;  %v1906_v14 = vadd.f32 %v4108_v32, %v1905_v5  ;;  %v1671_v5 = vand.u32 2147483647, %v4106_v26 }
 0x236   : > { %v1663_v20 = vmul.f32 %v4124_v57, %v4106_v26  ;;  %v4135_v2 = vpop.xlane.xlu2 %1497  ;;  %v4140_v30 = vpop.eup %2975  ;;  %v1895_v11 = vsel %vm4128_vm13, %v2970_v59, %v1891_v48  ;;  %v791_v59 = vld [vmem:[%s5091_s2 + $0x68] sm:$0xff]  ;;  %v1914_v48 = vor.u32 1.1754944e-38, %v1913_v21  ;;  %vm1668_vm6 = vweird.f32 %v4124_v57 }
 0x237   : > { %v4145_v60 = vpop.xlane.xlu1 %1499  ;;  %2977 = vrcp.f32 %v4135_v2  ;;  %v1678_v24 = vmul.f32 %v4140_v30, %v4113_v43  ;;  %2201 = vmatpush.msrb.mxu0 %v791_v59  ;;  %v1900_v4 = vsel %vm1897_vm15, %v1899_v15, %v1895_v11  ;;  %v1910_v61 = vsel %vm4158_vm2, %v4108_v32, %v1906_v14  ;;  %v2017_v59 = vld [vmem:[%s4094_s17 + $0x50] sm:$0xff]  ;;  %vm4219_vm10 = vmor %vm1667_vm7, %vm1668_vm6 }
 0x238   : > { %v1664_v63 = vsub.f32 1.0, %v1663_v20  ;;  %2979 = vrcp.f32 %v4145_v60  ;;  %v1901_v47 = vmul.f32 1.1111112, %v1900_v4  ;;  %v1686_v32 = vand.u32 2147483647, %v4113_v43 }
 0x239   : > { %2202 = vmatpush.msrb.mxu0 %v790_v18  ;;  %v1679_v1 = vsub.f32 1.0, %v1678_v24  ;;  %v1688_v26 = vand.u32 2147483648, %v4113_v43  ;;  %vm4225_vm11 = vcmp.eq.f32.partialorder %v1671_v5, 8.507059e+37  ;;  %vm1683_vm13 = vweird.f32 %v4140_v30 }
 0x23a   : > { %v1665_v41 = vmul.f32 %v4124_v57, %v1664_v63  ;;  %v2159_v20 = vmul.f32 %v3817_v45, %v1901_v47  ;;  %v1915_v45 = vsel %vm4175_vm4, %v1914_v48, %v1910_v61  ;;  %vm4233_vm12 = vcmp.eq.f32.partialorder %v1686_v32, 8.507059e+37  ;;  %v788_v48 = vld [vmem:[%s5091_s2 + $0x50] sm:$0xff]  ;;  %v787_v32 = vld [vmem:[%s5091_s2 + $0x48] sm:$0xff]  ;;  %vm4259_vm15 = vmor %vm1682_vm9, %vm1683_vm13 }
 0x23b   : > { %2203 = vmatpush.msrb.mxu0 %v789_v3  ;;  %v1916_v50 = vmul.f32 1.1111112, %v1915_v45  ;;  %v1689_v55 = vor.u32 1.1754944e-38, %v1688_v26  ;;  %v2788_v3 = vxor.u32 2147483648, %v2024_v40  ;;  %vm1787_vm1 = vweird.f32 %v4135_v2 }
 0x23c   : > { %v1666_v8 = vadd.f32 %v4124_v57, %v1665_v41  ;;  %2827 = vmatmul.msk.f32.vlgmr.msrb.gmra.mxu3 %vm4167_vm3, %v2159_v20  ;;  %v1680_v41 = vmul.f32 %v4140_v30, %v1679_v1  ;;  %v2781_v1 = vxor.u32 2147483648, %v2017_v59  ;;  %v1793_v20 = vand.u32 2147483648, %v4135_v2 }
 0x23d   : > { %v4186_v15 = vpop.eup %2977  ;;  %2204 = vmatpush.msrb.mxu0 %v788_v48  ;;  %v1791_v59 = vand.u32 2147483647, %v4135_v2  ;;  %v2160_v6 = vmul.f32 %v3820_v46, %v1916_v50  ;;  %vm1802_vm2 = vweird.f32 %v4145_v60  ;;  %v1808_v43 = vand.u32 2147483648, %v4145_v60 }
 0x23e   : > { %v4192_v54 = vpop.eup %2979  ;;  %v1783_v11 = vmul.f32 %v4186_v15, %v4135_v2  ;;  %v4197_v44 = vpop.xlane.xlu0 %1517  ;;  %v1670_v47 = vsel %vm4219_vm10, %v4124_v57, %v1666_v8  ;;  %vm1788_vm14 = vweird.f32 %v4186_v15  ;;  %vm4320_vm7 = vcmp.ge.s32.totalorder %v2781_v1, 2576980378 }
 0x23f   : > { %v4199_v14 = vpop.xlane.xlu2 %1515  ;;  %v1798_v63 = vmul.f32 %v4192_v54, %v4145_v60  ;;  %2981 = vrcp.f32 %v4197_v44  ;;  %v4214_v24 = vpop.xlane.xlu1 %1485  ;;  %v1675_v8 = vsel %vm4225_vm11, %v1674_v36, %v1670_v47  ;;  %2205 = vmatpush.msrb.mxu0 %v787_v32  ;;  %vm1803_vm3 = vweird.f32 %v4192_v54  ;;  %vm4276_vm4 = vmor %vm1787_vm1, %vm1788_vm14 }
 0x240   : > { %v1784_v38 = vsub.f32 1.0, %v1783_v11  ;;  %2983 = vrcp.f32 %v4214_v24  ;;  %v1681_v11 = vadd.f32 %v4140_v30, %v1680_v41  ;;  %v1676_v36 = vmul.f32 1.1111112, %v1675_v8  ;;  %v786_v41 = vld [vmem:[%s5091_s2 + $0x40] sm:$0xff]  ;;  %vm4316_vm6 = vmor %vm1802_vm2, %vm1803_vm3 }
 0x241   : > { %v1799_v18 = vsub.f32 1.0, %v1798_v63  ;;  %2985 = vrcp.f32 %v4199_v14  ;;  %2206 = vmatpush.msrb.mxu0 %v786_v41  ;;  %vm4324_vm9 = vcmp.ge.s32.totalorder %v2788_v3, 2576980378  ;;  %v1809_v1 = vor.u32 1.1754944e-38, %v1808_v43 }
 0x242   : > { %v1785_v5 = vmul.f32 %v4186_v15, %v1784_v38  ;;  %v1685_v46 = vsel %vm4259_vm15, %v4140_v30, %v1681_v11  ;;  %v2144_v40 = vmul.f32 %v3825_v56, %v1676_v36  ;;  %v1794_v30 = vor.u32 1.1754944e-38, %v1793_v20  ;;  %v4310_v20 = vld [vmem:[%s4094_s17 + $0x58] sm:$0xff]  ;;  %v2025_v11 = vld [vmem:[%s4094_s17 + $0x90] sm:$0xff] }
 0x243   : > { %v1800_v57 = vmul.f32 %v4192_v54, %v1799_v18  ;;  %v1690_v56 = vsel %vm4233_vm12, %v1689_v55, %v1685_v46  ;;  %2207 = vmatpush.msrb.mxu0 %v785_v62  ;;  %v2782_v4 = vxor.u32 2147483648, %v4310_v20  ;;  %v2789_v46 = vxor.u32 2147483648, %v2025_v11  ;;  %v782_v11 = vld [vmem:[%s5091_s2 + $0x20] sm:$0xff] }
 0x244   : > { %v1786_v45 = vadd.f32 %v4186_v15, %v1785_v5  ;;  %2828 = vmatmul.msk.f32.gmra.mxu3 %vm4179_vm5, %v2160_v6  ;;  %2812 = vmatmul.msk.f32.gmra.mxu1 %vm4201_vm8, %v2144_v40  ;;  %vm1792_vm5 = vcmp.eq.f32.partialorder %v1791_v59, 8.507059e+37  ;;  %v1691_v59 = vmul.f32 1.1111112, %v1690_v56  ;;  %vm1937_vm10 = vweird.f32 %v4197_v44 }
 0x245   : > { %v4253_v26 = vpop.eup %2981  ;;  %v1801_v50 = vadd.f32 %v4192_v54, %v1800_v57  ;;  %vm1697_vm12 = vweird.f32 %v4214_v24  ;;  %vm1922_vm13 = vweird.f32 %v4199_v14  ;;  %v1928_v61 = vand.u32 2147483648, %v4199_v14 }
 0x246   : > { %v4269_v38 = vpop.eup %2983  ;;  %v1790_v47 = vsel %vm4276_vm4, %v4186_v15, %v1786_v45  ;;  %v1933_v5 = vmul.f32 %v4253_v26, %v4197_v44  ;;  %v1806_v15 = vand.u32 2147483647, %v4145_v60  ;;  %v4330_v45 = vld [vmem:[%s4094_s17 + $0xd0] sm:$0xff]  ;;  %vm1938_vm1 = vweird.f32 %v4253_v26 }
 0x247   : > { %v1693_v2 = vmul.f32 %v4269_v38, %v4214_v24  ;;  %v4288_v18 = vpop.xlane.xlu2 %1501  ;;  %v4294_v48 = vpop.eup %2985  ;;  %v1795_v8 = vsel %vm1792_vm5, %v1794_v30, %v1790_v47  ;;  %v1805_v36 = vsel %vm4316_vm6, %v4192_v54, %v1801_v50  ;;  %v1943_v47 = vand.u32 2147483648, %v4197_v44 }
 0x248   : > { %2987 = vrcp.f32 %v4288_v18  ;;  %v1918_v32 = vmul.f32 %v4294_v48, %v4199_v14  ;;  %v1796_v60 = vmul.f32 1.1111112, %v1795_v8  ;;  %v1934_v6 = vsub.f32 1.0, %v1933_v5 }
 0x249   : > { %v1694_v57 = vsub.f32 1.0, %v1693_v2  ;;  %vm1807_vm8 = vcmp.eq.f32.partialorder %v1806_v15, 8.507059e+37  ;;  %v2797_v2 = vxor.u32 2147483648, %v4330_v45  ;;  %v1701_v30 = vand.u32 2147483647, %v4214_v24 }
 0x24a   : > { %v1919_v41 = vsub.f32 1.0, %v1918_v32  ;;  %v2152_v3 = vmul.f32 %v3836_v16, %v1796_v60  ;;  %v1703_v54 = vand.u32 2147483648, %v4214_v24  ;;  %v1810_v50 = vsel %vm1807_vm8, %v1809_v1, %v1805_v36  ;;  %v783_v32 = vld [vmem:[%s5091_s2 + $0x28] sm:$0xff] }
 0x24b   : > { %v1695_v63 = vmul.f32 %v4269_v38, %v1694_v57  ;;  %vm1698_vm11 = vweird.f32 %v4269_v38  ;;  %v2145_v5 = vmul.f32 %v3829_v0, %v1691_v59  ;;  %v784_v57 = vld [vmem:[%s5091_s2 + $0x30] sm:$0xff]  ;;  %v1935_v20 = vmul.f32 %v4253_v26, %v1934_v6  ;;  %v781_v59 = vld [vmem:[%s5091_s2 + $0x18] sm:$0xff] }
 0x24c   : > { %2820 = vmatmul.msk.f32.gmra.mxu2 %vm4324_vm9, %v2152_v3  ;;  %v1920_v0 = vmul.f32 %v4294_v48, %v1919_v41  ;;  %2208 = vmatpush.msrb.mxu0 %v784_v57  ;;  %v1811_v21 = vmul.f32 1.1111112, %v1810_v50  ;;  %vm1699_vm14 = vmor %vm1697_vm12, %vm1698_vm11  ;;  %v1704_v24 = vor.u32 1.1754944e-38, %v1703_v54  ;;  %vm1923_vm15 = vweird.f32 %v4294_v48  ;;  %v779_v41 = vld [vmem:[%s5091_s2 + $0x8] sm:$0xff] }
 0x24d   : > { %v1696_v15 = vadd.f32 %v4269_v38, %v1695_v63  ;;  %2813 = vmatmul.msk.f32.gmra.mxu1 %vm4320_vm7, %v2145_v5  ;;  %v1926_v63 = vand.u32 2147483647, %v4199_v14  ;;  %vm1702_vm2 = vcmp.eq.f32.partialorder %v1701_v30, 8.507059e+37  ;;  %vm4386_vm3 = vcmp.ge.s32.totalorder %v2789_v46, 2576980378  ;;  %vm4394_vm4 = vmor %vm1922_vm13, %vm1923_vm15 }
 0x24e   : > { %v4339_v40 = vpop.eup %2987  ;;  %v4345_v43 = vpop.xlane.xlu1 %1519  ;;  %2209 = vmatpush.msrb.mxu0 %v783_v32  ;;  %v1921_v1 = vadd.f32 %v4294_v48, %v1920_v0  ;;  %v1936_v6 = vadd.f32 %v4253_v26, %v1935_v20  ;;  %v2153_v46 = vmul.f32 %v3838_v17, %v1811_v21  ;;  %v1941_v54 = vand.u32 2147483647, %v4197_v44  ;;  %vm4414_vm7 = vmor %vm1937_vm10, %vm1938_vm1 }
 0x24f   : > { %v1813_v16 = vmul.f32 %v4339_v40, %v4288_v18  ;;  %v4353_v56 = vpop.xlane.xlu0 %1503  ;;  %v4355_v62 = vpop.xlane.xlu2 %1487  ;;  %v1700_v55 = vsel %vm1699_vm14, %v4269_v38, %v1696_v15  ;;  %v1929_v38 = vor.u32 1.1754944e-38, %v1928_v61  ;;  %vm4401_vm5 = vcmp.ge.s32.totalorder %v2782_v4, 2576980378 }
 0x250   : > { %2989 = vrcp.f32 %v4355_v62  ;;  %v1705_v60 = vsel %vm1702_vm2, %v1704_v24, %v1700_v55  ;;  %2210 = vmatpush.msrb.mxu0 %v782_v11  ;;  %v1925_v14 = vsel %vm4394_vm4, %v4294_v48, %v1921_v1  ;;  %vm1927_vm6 = vcmp.eq.f32.partialorder %v1926_v63, 8.507059e+37  ;;  %v2034_v55 = vld [vmem:[%s4094_s17 + $0xd8] sm:$0xff] }
 0x251   : > { %v1814_v8 = vsub.f32 1.0, %v1813_v16  ;;  %2991 = vrcp.f32 %v4345_v43  ;;  %v1706_v30 = vmul.f32 1.1111112, %v1705_v60  ;;  %v1821_v4 = vand.u32 2147483647, %v4288_v18  ;;  %v2019_v60 = vld [vmem:[%s4094_s17 + $0x60] sm:$0xff] }
 0x252   : > { %2993 = vrcp.f32 %v4353_v56  ;;  %2211 = vmatpush.msrb.mxu0 %v781_v59  ;;  %v1823_v5 = vand.u32 2147483648, %v4288_v18  ;;  %v1930_v48 = vsel %vm1927_vm6, %v1929_v38, %v1925_v14  ;;  %v1944_v44 = vor.u32 1.1754944e-38, %v1943_v47 }
 0x253   : > { %v1815_v3 = vmul.f32 %v4339_v40, %v1814_v8  ;;  %v2146_v15 = vmul.f32 %v3849_v27, %v1706_v30  ;;  %v1931_v61 = vmul.f32 1.1111112, %v1930_v48  ;;  %v2026_v8 = vld [vmem:[%s4094_s17 + $0x98] sm:$0xff]  ;;  %v1940_v27 = vsel %vm4414_vm7, %v4253_v26, %v1936_v6  ;;  %v780_v6 = vld [vmem:[%s5091_s2 + $0x10] sm:$0xff] }
 0x254   : > { %2821 = vmatmul.msk.f32.gmra.mxu2 %vm4386_vm3, %v2153_v46  ;;  %vm1818_vm9 = vweird.f32 %v4339_v40  ;;  %vm4442_vm8 = vcmp.ge.s32.totalorder %v2797_v2, 2576980378  ;;  %vm1817_vm10 = vweird.f32 %v4288_v18  ;;  %vm1942_vm11 = vcmp.eq.f32.partialorder %v1941_v54, 8.507059e+37  ;;  %2212 = vmatpush.msrb.mxu0 %v780_v6 }
 0x255   : > { %2814 = vmatmul.msk.f32.gmra.mxu1 %vm4401_vm5, %v2146_v15  ;;  %v1816_v11 = vadd.f32 %v4339_v40, %v1815_v3  ;;  %v2161_v24 = vmul.f32 %v3845_v37, %v1931_v61  ;;  %v1824_v59 = vor.u32 1.1754944e-38, %v1823_v5  ;;  %vm4451_vm12 = vcmp.eq.f32.partialorder %v1821_v4, 8.507059e+37  ;;  %vm4457_vm13 = vmor %vm1817_vm10, %vm1818_vm9  ;;  %v778_v4 = vld [vmem:[%s5091_s2] sm:$0xff] }
 0x256   : > { %v4408_v16 = vpop.eup %2989  ;;  %v4425_v32 = vpop.xlane.xlu1 %1489  ;;  %v2790_v45 = vxor.u32 2147483648, %v2026_v8  ;;  %v1945_v2 = vsel %vm1942_vm11, %v1944_v44, %v1940_v27  ;;  %v1838_v37 = vand.u32 2147483648, %v4353_v56  ;;  %v2798_v46 = vxor.u32 2147483648, %v2034_v55  ;;  %2213 = vmatpush.msrb.mxu0 %v779_v41 }
 0x257   : > { %v4423_v57 = vpop.xlane.xlu0 %1463  ;;  %v4427_v20 = vpop.eup %2991  ;;  %v1708_v0 = vmul.f32 %v4408_v16, %v4355_v62  ;;  %2829 = vmatmul.msk.f32.gmra.mxu3 %vm4442_vm8, %v2161_v24  ;;  %v1820_v30 = vsel %vm4457_vm13, %v4339_v40, %v1816_v11  ;;  %v1716_v54 = vand.u32 2147483647, %v4355_v62  ;;  %v1718_v50 = vand.u32 2147483648, %v4355_v62 }
 0x258   : > { %v4435_v21 = vpop.eup %2993  ;;  %2995 = vrcp.f32 %v4423_v57  ;;  %v1318_v63 = vpop.xlane.xlu2 %1317  ;;  %v1948_v1 = vmul.f32 %v4427_v20, %v4345_v43  ;;  %v1825_v14 = vsel %vm4451_vm12, %v1824_v59, %v1820_v30  ;;  %v1946_v17 = vmul.f32 1.1111112, %v1945_v2  ;;  %2214 = vmatpush.msrb.mxu0 %v778_v4 }
 0x259   : > { %v1709_v26 = vsub.f32 1.0, %v1708_v0  ;;  %v1828_v18 = vmul.f32 %v4435_v21, %v4353_v56  ;;  %2997 = vrcp.f32 %v4425_v32  ;;  %v1374_v3 = vsub.f32 %v3878_v7, %v1318_v63 }
 0x25a   : > { %v1826_v15 = vmul.f32 1.1111112, %v1825_v14  ;;  %vm4489_vm14 = vcmp.ge.s32.totalorder %v2790_v45, 2576980378  ;;  %v1949_v44 = vsub.f32 1.0, %v1948_v1  ;;  %vm1713_vm15 = vweird.f32 %v4408_v16 }
 0x25b   : > { %v1710_v38 = vmul.f32 %v4408_v16, %v1709_v26  ;;  %v1413_v7 = vmul.f32 1.442695, %v1374_v3  ;;  %v1829_v48 = vsub.f32 1.0, %v1828_v18  ;;  %vm4497_vm1 = vcmp.ge.s32.totalorder %v2798_v46, 2576980378 }
 0x25c   : > { %v2154_v61 = vmul.f32 %v3857_v10, %v1826_v15  ;;  %vm1832_vm2 = vweird.f32 %v4353_v56  ;;  %v1836_v26 = vand.u32 2147483647, %v4353_v56  ;;  %vm1952_vm3 = vweird.f32 %v4345_v43  ;;  %v2035_v15 = vld [vmem:[%s4094_s17 + $0xe0] sm:$0xff] }
 0x25d   : > { %2999 = vpow2.f32 %v1413_v7  ;;  %v1711_v47 = vadd.f32 %v4408_v16, %v1710_v38  ;;  %v2162_v10 = vmul.f32 %v3847_v25, %v1946_v17  ;;  %v1956_v63 = vand.u32 2147483647, %v4345_v43 }
 0x25e   : > { %v4487_v5 = vpop.eup %2995  ;;  %v1958_v55 = vand.u32 2147483648, %v4345_v43  ;;  %vm1712_vm4 = vweird.f32 %v4355_v62  ;;  %2822 = vmatmul.msk.f32.gmra.mxu2 %vm4489_vm14, %v2154_v61  ;;  %v1830_v45 = vmul.f32 %v4435_v21, %v1829_v48  ;;  %vm1833_vm5 = vweird.f32 %v4435_v21 }
 0x25f   : > { %v1528_v0 = vmul.f32 %v4487_v5, %v4423_v57  ;;  %v4501_v27 = vpop.xlane.xlu1 %1505  ;;  %v4504_v11 = vpop.eup %2997  ;;  %v1839_v2 = vor.u32 1.1754944e-38, %v1838_v37  ;;  %vm1714_vm6 = vmor %vm1712_vm4, %vm1713_vm15  ;;  %v1719_v25 = vor.u32 1.1754944e-38, %v1718_v50  ;;  %2830 = vmatmul.msk.f32.gmra.mxu3 %vm4497_vm1, %v2162_v10  ;;  %v1950_v62 = vmul.f32 %v4427_v20, %v1949_v44  ;;  %v2027_v50 = vld [vmem:[%s4094_s17 + $0xa0] sm:$0xff] }
 0x260   : > { %v4510_v24 = vpop.xlane.xlu0 %1507  ;;  %v4524_v36 = vpop.xlane.xlu2 %1521  ;;  %v1536_v18 = vand.u32 2147483647, %v4423_v57  ;;  %v1715_v1 = vsel %vm1714_vm6, %v4408_v16, %v1711_v47  ;;  %vm1717_vm7 = vcmp.eq.f32.partialorder %v1716_v54, 8.507059e+37  ;;  %v1723_v37 = vmul.f32 %v4504_v11, %v4425_v32  ;;  %vm4549_vm11 = vmor %vm1832_vm2, %vm1833_vm5 }
 0x261   : > { %v1529_v59 = vsub.f32 1.0, %v1528_v0  ;;  %3001 = vrcp.f32 %v4501_v27  ;;  %v1720_v6 = vsel %vm1717_vm7, %v1719_v25, %v1715_v1  ;;  %v2783_v41 = vxor.u32 2147483648, %v2019_v60 }
 0x262   : > { %vm1953_vm9 = vweird.f32 %v4427_v20  ;;  %v1959_v3 = vor.u32 1.1754944e-38, %v1958_v55  ;;  %v1721_v46 = vmul.f32 1.1111112, %v1720_v6  ;;  %vm1532_vm8 = vweird.f32 %v4423_v57 }
 0x263   : > { %v4532_v38 = vpop.eup %2999  ;;  %v1530_v30 = vmul.f32 %v4487_v5, %v1529_v59  ;;  %3003 = vrcp.f32 %v4524_v36  ;;  %vm4540_vm10 = vcmp.ge.s32.totalorder %v2783_v41, 2576980378  ;;  %v1831_v54 = vadd.f32 %v4435_v21, %v1830_v45  ;;  %vm4569_vm13 = vmor %vm1952_vm3, %vm1953_vm9  ;;  %v2007_v41 = vld [vmem:[%s4094_s17] sm:$0xff] }
 0x264   : > { %1477 = vadd.xlane.f32.xlu0 %v4532_v38  ;;  %vm4553_vm12 = vcmp.eq.f32.partialorder %v1536_v18, 8.507059e+37  ;;  %v1538_v4 = vand.u32 2147483648, %v4423_v57  ;;  %3005 = vrcp.f32 %v4510_v24  ;;  %v2147_v7 = vmul.f32 %v3865_v49, %v1721_v46 }
 0x265   : > { %v1724_v40 = vsub.f32 1.0, %v1723_v37  ;;  %v1835_v56 = vsel %vm4549_vm11, %v4435_v21, %v1831_v54  ;;  %v2791_v48 = vxor.u32 2147483648, %v2027_v50  ;;  %v1951_v44 = vadd.f32 %v4427_v20, %v1950_v62 }
 0x266   : > { %v1531_v61 = vadd.f32 %v4487_v5, %v1530_v30  ;;  %vm1533_vm14 = vweird.f32 %v4487_v5  ;;  %v1733_v49 = vand.u32 2147483648, %v4425_v32  ;;  %2815 = vmatmul.msk.f32.gmra.mxu1 %vm4540_vm10, %v2147_v7  ;;  %vm1837_vm15 = vcmp.eq.f32.partialorder %v1836_v26, 8.507059e+37 }
 0x267   : > { %v4578_v21 = vpop.xlane.xlu1 %1523  ;;  %v4580_v8 = vpop.eup %3001  ;;  %v1840_v47 = vsel %vm1837_vm15, %v1839_v2, %v1835_v56  ;;  %v1955_v43 = vsel %vm4569_vm13, %v4427_v20, %v1951_v44  ;;  %vm1957_vm1 = vcmp.eq.f32.partialorder %v1956_v63, 8.507059e+37  ;;  %v2799_v10 = vxor.u32 2147483648, %v2035_v15  ;;  %vm4594_vm3 = vmor %vm1532_vm8, %vm1533_vm14 }
 0x268   : > { %v4585_v55 = vpop.xlane.xlu0 %1491  ;;  %v1539_v59 = vor.u32 1.1754944e-38, %v1538_v4  ;;  %vm1727_vm2 = vweird.f32 %v4425_v32  ;;  %v1841_v60 = vmul.f32 1.1111112, %v1840_v47  ;;  %v1960_v45 = vsel %vm1957_vm1, %v1959_v3, %v1955_v43  ;;  %v4604_v18 = vpop.xlane.xlu2 %1465 }
 0x269   : > { %v4588_v26 = vpop.eup %3003  ;;  %v1725_v20 = vmul.f32 %v4504_v11, %v1724_v40  ;;  %v1868_v63 = vand.u32 2147483648, %v4510_v24  ;;  %vm4600_vm4 = vcmp.ge.s32.totalorder %v2791_v48, 2576980378  ;;  %v1961_v62 = vmul.f32 1.1111112, %v1960_v45 }
 0x26a   : > { %v4606_v1 = vpop.eup %3005  ;;  %v1535_v57 = vsel %vm4594_vm3, %v4487_v5, %v1531_v61  ;;  %v1843_v37 = vmul.f32 %v4580_v8, %v4501_v27  ;;  %v2155_v6 = vmul.f32 %v3869_v19, %v1841_v60  ;;  %vm2125_vm5 = vcmp.ge.s32.totalorder %v2799_v10, 2576980378  ;;  %v2020_v19 = vld [vmem:[%s4094_s17 + $0x68] sm:$0xff] }
 0x26b   : > { %v1731_v3 = vand.u32 2147483647, %v4425_v32  ;;  %v1734_v30 = vor.u32 1.1754944e-38, %v1733_v49  ;;  %v2163_v46 = vmul.f32 %v3867_v51, %v1961_v62  ;;  %3007 = vrcp.f32 %v4585_v55 }
 0x26c   : > { %vm1728_vm6 = vweird.f32 %v4504_v11  ;;  %v1866_v50 = vand.u32 2147483647, %v4510_v24  ;;  %v1963_v5 = vmul.f32 %v4588_v26, %v4524_v36  ;;  %2823 = vmatmul.msk.f32.gmra.mxu2 %vm4600_vm4, %v2155_v6  ;;  %3009 = vrcp.f32 %v4604_v18 }
 0x26d   : > { %v1858_v16 = vmul.f32 %v4606_v1, %v4510_v24  ;;  %v4628_v54 = vor.u32 1.1754944e-38, %v1868_v63  ;;  %2831 = vmatmul.msk.f32.gmra.mxu3 %vm2125_vm5, %v2163_v46  ;;  %v1540_v51 = vsel %vm4553_vm12, %v1539_v59, %v1535_v57  ;;  %v2771_v14 = vxor.u32 2147483648, %v2007_v41  ;;  %vm1729_vm7 = vmor %vm1727_vm2, %vm1728_vm6  ;;  %v2028_v57 = vld [vmem:[%s4094_s17 + $0xa8] sm:$0xff] }
 0x26e   : > { %v1844_v4 = vsub.f32 1.0, %v1843_v37  ;;  %v1853_v7 = vand.u32 2147483648, %v4501_v27  ;;  %v1541_v15 = vmul.f32 1.1111112, %v1540_v51  ;;  %v1726_v40 = vadd.f32 %v4504_v11, %v1725_v20 }
 0x26f   : > { %vm1847_vm9 = vweird.f32 %v4501_v27  ;;  %v1851_v56 = vand.u32 2147483647, %v4501_v27  ;;  %vm4640_vm8 = vcmp.ge.s32.totalorder %v2771_v14, 2576980378  ;;  %v2784_v17 = vxor.u32 2147483648, %v2020_v19  ;;  %v4646_v49 = vpop.xlane.xlu1 %1509  ;;  %v2036_v14 = vld [vmem:[%s4094_s17 + $0xe8] sm:$0xff] }
 0x270   : > { %v1964_v44 = vsub.f32 1.0, %v1963_v5  ;;  %v2135_v0 = vmul.f32 %v3880_v29, %v1541_v15  ;;  %v1730_v61 = vsel %vm1729_vm7, %v4504_v11, %v1726_v40  ;;  %vm1732_vm10 = vcmp.eq.f32.partialorder %v1731_v3, 8.507059e+37  ;;  %v4652_v59 = vpop.xlane.xlu0 %1467 }
 0x271   : > { %v4648_v47 = vpop.eup %3007  ;;  %v1859_v32 = vsub.f32 1.0, %v1858_v16  ;;  %v1973_v43 = vand.u32 2147483648, %v4524_v36  ;;  %3011 = vrcp.f32 %v4578_v21  ;;  %v1735_v10 = vsel %vm1732_vm10, %v1734_v30, %v1730_v61 }
 0x272   : > { %v4654_v60 = vpop.eup %3009  ;;  %v1845_v29 = vmul.f32 %v4580_v8, %v1844_v4  ;;  %v1854_v45 = vor.u32 1.1754944e-38, %v1853_v7  ;;  %vm1967_vm11 = vweird.f32 %v4524_v36  ;;  %2803 = vmatmul.msk.f32.vlgmr.msrb.gmra.mxu0 %vm4640_vm8, %v2135_v0  ;;  %v1736_v11 = vmul.f32 1.1111112, %v1735_v10 }
 0x273   : > { %vm1848_vm12 = vweird.f32 %v4580_v8  ;;  %v1971_v2 = vand.u32 2147483647, %v4524_v36  ;;  %v1748_v20 = vand.u32 2147483648, %v4585_v55  ;;  %vm2080_vm13 = vcmp.ge.s32.totalorder %v2784_v17, 2576980378 }
 0x274   : > { %v1965_v63 = vmul.f32 %v4588_v26, %v1964_v44  ;;  %v1543_v25 = vmul.f32 %v4654_v60, %v4604_v18  ;;  %v2148_v62 = vmul.f32 %v3882_v22, %v1736_v11  ;;  %3013 = vrcp.f32 %v4652_v59  ;;  %vm1849_vm15 = vmor %vm1847_vm9, %vm1848_vm12 }
 0x275   : > { %v4670_v37 = vmul.f32 %v4606_v1, %v1859_v32  ;;  %vm1968_vm14 = vweird.f32 %v4588_v26  ;;  %v1974_v6 = vor.u32 1.1754944e-38, %v1973_v43  ;;  %v1738_v41 = vmul.f32 %v4648_v47, %v4585_v55 }
 0x276   : > { %v1746_v3 = vand.u32 2147483647, %v4585_v55  ;;  %v1986_v30 = vand.u32 2147483647, %v4578_v21  ;;  %v1988_v46 = vand.u32 2147483648, %v4578_v21  ;;  %2816 = vmatmul.msk.f32.gmra.mxu1 %vm2080_vm13, %v2148_v62  ;;  %v1846_v22 = vadd.f32 %v4580_v8, %v1845_v29  ;;  %vm1969_vm5 = vmor %vm1967_vm11, %vm1968_vm14 }
 0x277   : > { %v4679_v5 = vpop.eup %3011  ;;  %v4685_v19 = vor.u32 1.1754944e-38, %v1748_v20  ;;  %v1553_v16 = vand.u32 2147483648, %v4604_v18  ;;  %3015 = vrcp.f32 %v4646_v49  ;;  %v2792_v51 = vxor.u32 2147483648, %v2028_v57  ;;  %v4706_v61 = vpop.xlane.xlu1 %1493 }
 0x278   : > { %v1544_v4 = vsub.f32 1.0, %v1543_v25  ;;  %v1850_v7 = vsel %vm1849_vm15, %v4580_v8, %v1846_v22  ;;  %vm1852_vm1 = vcmp.eq.f32.partialorder %v1851_v56, 8.507059e+37  ;;  %v1966_v15 = vadd.f32 %v4588_v26, %v1965_v63  ;;  %v4717_v20 = vpop.xlane.xlu0 %1471  ;;  %v4719_v63 = vpop.xlane.xlu2 %1525 }
 0x279   : > { %v1739_v40 = vsub.f32 1.0, %v1738_v41  ;;  %vm1742_vm2 = vweird.f32 %v4585_v55  ;;  %vm1547_vm3 = vweird.f32 %v4604_v18  ;;  %v1551_v27 = vand.u32 2147483647, %v4604_v18 }
 0x27a   : > { %v1855_v48 = vsel %vm1852_vm1, %v1854_v45, %v1850_v7  ;;  %v4695_v17 = vpop.eup %3013  ;;  %vm1863_vm4 = vweird.f32 %v4606_v1  ;;  %v1978_v8 = vmul.f32 %v4679_v5, %v4578_v21  ;;  %v4704_v56 = vor.u32 1.1754944e-38, %v1988_v46 }
 0x27b   : > { %v1856_v44 = vmul.f32 1.1111112, %v1855_v48  ;;  %v2800_v0 = vxor.u32 2147483648, %v2036_v14  ;;  %v1554_v32 = vor.u32 1.1754944e-38, %v1553_v16  ;;  %vm4708_vm6 = vcmp.ge.s32.totalorder %v2792_v51, 2576980378 }
 0x27c   : > { %v1970_v10 = vsel %vm1969_vm5, %v4588_v26, %v1966_v15  ;;  %vm1972_vm7 = vcmp.eq.f32.partialorder %v1971_v2, 8.507059e+37  ;;  %vm1862_vm9 = vweird.f32 %v4510_v24  ;;  %v1545_v36 = vmul.f32 %v4654_v60, %v1544_v4  ;;  %v2021_v51 = vld [vmem:[%s4094_s17 + $0x70] sm:$0xff] }
 0x27d   : > { %v1568_v29 = vand.u32 2147483648, %v4652_v59  ;;  %v2156_v45 = vmul.f32 %v3893_v33, %v1856_v44  ;;  %v1975_v11 = vsel %vm1972_vm7, %v1974_v6, %v1970_v10  ;;  %v4721_v25 = vpop.eup %3015  ;;  %v1740_v62 = vmul.f32 %v4648_v47, %v1739_v40  ;;  %v2008_v33 = vld [vmem:[%s4094_s17 + $0x8] sm:$0xff]  ;;  %vm4778_vm5 = vmor %vm1862_vm9, %vm1863_vm4 }
 0x27e   : > { %v1558_v26 = vmul.f32 %v4695_v17, %v4652_v59  ;;  %v1976_v2 = vmul.f32 1.1111112, %v1975_v11  ;;  %3017 = vrcp.f32 %v4706_v61  ;;  %vm1743_vm8 = vweird.f32 %v4648_v47 }
 0x27f   : > { %v1979_v57 = vsub.f32 1.0, %v1978_v8  ;;  %vm1548_vm10 = vweird.f32 %v4654_v60  ;;  %2824 = vmatmul.msk.f32.gmra.mxu2 %vm4708_vm6, %v2156_v45  ;;  %vm2128_vm11 = vcmp.ge.s32.totalorder %v2800_v0, 2576980378  ;;  %vm1982_vm12 = vweird.f32 %v4578_v21  ;;  %vm4752_vm15 = vmor %vm1742_vm2, %vm1743_vm8 }
 0x280   : > { %vm1983_vm13 = vweird.f32 %v4679_v5  ;;  %v1566_v6 = vand.u32 2147483647, %v4652_v59  ;;  %v2164_v41 = vmul.f32 %v3895_v34, %v1976_v2  ;;  %3019 = vrcp.f32 %v4717_v20  ;;  %vm1549_vm14 = vmor %vm1547_vm3, %vm1548_vm10 }
 0x281   : > { %v1873_v46 = vmul.f32 %v4721_v25, %v4646_v49  ;;  %v1883_v22 = vand.u32 2147483648, %v4646_v49  ;;  %3021 = vrcp.f32 %v4719_v63  ;;  %v1546_v16 = vadd.f32 %v4654_v60, %v1545_v36 }
 0x282   : > { %v1559_v14 = vsub.f32 1.0, %v1558_v26  ;;  %v4745_v4 = vor.u32 1.1754944e-38, %v1568_v29  ;;  %2832 = vmatmul.msk.f32.gmra.mxu3 %vm2128_vm11, %v2164_v41  ;;  %v2772_v34 = vxor.u32 2147483648, %v2008_v33  ;;  %v1741_v7 = vadd.f32 %v4648_v47, %v1740_v62  ;;  %vm1984_vm11 = vmor %vm1982_vm12, %vm1983_vm13  ;;  %v2022_v33 = vld [vmem:[%s4094_s17 + $0x78] sm:$0xff] }
 0x283   : > { %v1980_v40 = vmul.f32 %v4679_v5, %v1979_v57  ;;  %v1881_v18 = vand.u32 2147483647, %v4646_v49  ;;  %v1550_v48 = vsel %vm1549_vm14, %v4654_v60, %v1546_v16  ;;  %vm1552_vm1 = vcmp.eq.f32.partialorder %v1551_v27, 8.507059e+37  ;;  %v2029_v60 = vld [vmem:[%s4094_s17 + $0xb0] sm:$0xff]  ;;  %v4799_v57 = vpop.xlane.xlu2 %1469 }
 0x284   : > { %v4759_v8 = vpop.eup %3017  ;;  %vm1563_vm3 = vweird.f32 %v4695_v17  ;;  %v1555_v44 = vsel %vm1552_vm1, %v1554_v32, %v1550_v48  ;;  %v1745_v0 = vsel %vm4752_vm15, %v4648_v47, %v1741_v7  ;;  %v2785_v43 = vxor.u32 2147483648, %v2021_v51 }
 0x285   : > { %v1861_v10 = vadd.f32 %v4606_v1, %v4670_v37  ;;  %v1874_v36 = vsub.f32 1.0, %v1873_v46  ;;  %v4767_v29 = vor.u32 1.1754944e-38, %v1883_v22  ;;  %v1556_v45 = vmul.f32 1.1111112, %v1555_v44  ;;  %v2037_v46 = vld [vmem:[%s4094_s17 + $0xf0] sm:$0xff]  ;;  %v4820_v22 = vpop.xlane.xlu1 %1473 }
 0x286   : > { %vm1747_vm2 = vcmp.eq.f32.partialorder %v1746_v3, 8.507059e+37  ;;  %v4772_v27 = vpop.eup %3019  ;;  %v1560_v37 = vmul.f32 %v4695_v17, %v1559_v14  ;;  %vm1562_vm6 = vweird.f32 %v4652_v59  ;;  %vm1878_vm7 = vweird.f32 %v4721_v25 }
 0x287   : > { %vm4785_vm8 = vcmp.ge.s32.totalorder %v2772_v34, 2576980378  ;;  %v1750_v3 = vsel %vm1747_vm2, %v4685_v19, %v1745_v0  ;;  %v4790_v32 = vpop.eup %3021  ;;  %vm1877_vm4 = vweird.f32 %v4646_v49  ;;  %v1753_v11 = vmul.f32 %v4759_v8, %v4706_v61  ;;  %vm1564_vm1 = vmor %vm1562_vm6, %vm1563_vm3 }
 0x288   : > { %v2136_v62 = vmul.f32 %v3929_v53, %v1556_v45  ;;  %v1751_v26 = vmul.f32 1.1111112, %v1750_v3  ;;  %v1865_v2 = vsel %vm4778_vm5, %v4606_v1, %v1861_v10  ;;  %vm4801_vm9 = vcmp.ge.s32.totalorder %v2785_v43, 2576980378  ;;  %vm4855_vm2 = vmor %vm1877_vm4, %vm1878_vm7 }
 0x289   : > { %vm1867_vm10 = vcmp.eq.f32.partialorder %v1866_v50, 8.507059e+37  ;;  %v2793_v19 = vxor.u32 2147483648, %v2029_v60  ;;  %v1981_v41 = vadd.f32 %v4679_v5, %v1980_v40  ;;  %v1875_v53 = vmul.f32 %v4721_v25, %v1874_v36 }
 0x28a   : > { %v1588_v1 = vmul.f32 %v4772_v27, %v4717_v20  ;;  %2804 = vmatmul.msk.f32.gmra.mxu0 %vm4785_vm8, %v2136_v62  ;;  %v2149_v24 = vmul.f32 %v3916_v35, %v1751_v26  ;;  %v1870_v50 = vsel %vm1867_vm10, %v4628_v54, %v1865_v2  ;;  %v1993_v16 = vmul.f32 %v4790_v32, %v4719_v63 }
 0x28b   : > { %v1871_v51 = vmul.f32 1.1111112, %v1870_v50  ;;  %v1985_v14 = vsel %vm1984_vm11, %v4679_v5, %v1981_v41  ;;  %vm1987_vm12 = vcmp.eq.f32.partialorder %v1986_v30, 8.507059e+37  ;;  %v1754_v34 = vsub.f32 1.0, %v1753_v11  ;;  %v2009_v5 = vld [vmem:[%s4094_s17 + $0x10] sm:$0xff]  ;;  %v4873_v11 = vpop.xlane.xlu2 %1475 }
 0x28c   : > { %2817 = vmatmul.msk.f32.gmra.mxu1 %vm4801_vm9, %v2149_v24  ;;  %vm2107_vm13 = vcmp.ge.s32.totalorder %v2793_v19, 2576980378  ;;  %v1990_v35 = vsel %vm1987_vm12, %v4704_v56, %v1985_v14  ;;  %v2801_v54 = vxor.u32 2147483648, %v2037_v46  ;;  %vm1757_vm14 = vweird.f32 %v4706_v61  ;;  %v2030_v56 = vld [vmem:[%s4094_s17 + $0xb8] sm:$0xff] }
 0x28d   : > { %v2157_v7 = vmul.f32 %v3891_v31, %v1871_v51  ;;  %v1991_v15 = vmul.f32 1.1111112, %v1990_v35  ;;  %3023 = vrcp.f32 %v4820_v22  ;;  %v1761_v21 = vand.u32 2147483647, %v4706_v61  ;;  %v2038_v24 = vld [vmem:[%s4094_s17 + $0xf8] sm:$0xff] }
 0x28e   : > { %v1763_v30 = vand.u32 2147483648, %v4706_v61  ;;  %vm4836_vm15 = vcmp.ge.s32.totalorder %v2801_v54, 2576980378  ;;  %3025 = vrcp.f32 %v4799_v57  ;;  %v1589_v48 = vsub.f32 1.0, %v1588_v1  ;;  %v2010_v35 = vld [vmem:[%s4094_s17 + $0x18] sm:$0xff] }
 0x28f   : > { %v2001_v44 = vand.u32 2147483647, %v4719_v63  ;;  %2825 = vmatmul.msk.f32.gmra.mxu2 %vm2107_vm13, %v2157_v7  ;;  %v2165_v31 = vmul.f32 %v3914_v9, %v1991_v15  ;;  %v1561_v0 = vadd.f32 %v4695_v17, %v1560_v37  ;;  %v1755_v43 = vmul.f32 %v4759_v8, %v1754_v34 }
 0x290   : > { %v1994_v10 = vsub.f32 1.0, %v1993_v16  ;;  %v2773_v36 = vxor.u32 2147483648, %v2009_v5  ;;  %v1876_v45 = vadd.f32 %v4721_v25, %v1875_v53  ;;  %vm1997_vm5 = vweird.f32 %v4719_v63 }
 0x291   : > { %v2003_v9 = vand.u32 2147483648, %v4719_v63  ;;  %2833 = vmatmul.msk.f32.gmra.mxu3 %vm4836_vm15, %v2165_v31  ;;  %v1565_v47 = vsel %vm1564_vm1, %v4695_v17, %v1561_v0  ;;  %vm1567_vm3 = vcmp.eq.f32.partialorder %v1566_v6, 8.507059e+37  ;;  %v2794_v37 = vxor.u32 2147483648, %v2030_v56 }
 0x292   : > { %vm1758_vm6 = vweird.f32 %v4759_v8  ;;  %v1570_v55 = vsel %vm1567_vm3, %v4745_v4, %v1565_v47  ;;  %v1880_v3 = vsel %vm4855_vm2, %v4721_v25, %v1876_v45  ;;  %vm1882_vm7 = vcmp.eq.f32.partialorder %v1881_v18, 8.507059e+37 }
 0x293   : > { %v4875_v62 = vpop.eup %3023  ;;  %v1590_v59 = vmul.f32 %v4772_v27, %v1589_v48  ;;  %vm1593_vm8 = vweird.f32 %v4772_v27  ;;  %v1764_v17 = vor.u32 1.1754944e-38, %v1763_v30  ;;  %v1571_v6 = vmul.f32 1.1111112, %v1570_v55  ;;  %vm1759_vm10 = vmor %vm1757_vm14, %vm1758_vm6 }
 0x294   : > { %v1885_v26 = vsel %vm1882_vm7, %v4767_v29, %v1880_v3  ;;  %v3026_v4 = vpop.eup %3025  ;;  %v1995_v2 = vmul.f32 %v4790_v32, %v1994_v10  ;;  %vm4881_vm4 = vcmp.ge.s32.totalorder %v2773_v36, 2576980378  ;;  %v1756_v18 = vadd.f32 %v4759_v8, %v1755_v43 }
 0x295   : > { %v1886_v49 = vmul.f32 1.1111112, %v1885_v26  ;;  %vm1592_vm9 = vweird.f32 %v4717_v20  ;;  %v1573_v29 = vmul.f32 %v3026_v4, %v4799_v57  ;;  %v2137_v19 = vmul.f32 %v3950_v28, %v1571_v6 }
 0x296   : > { %vm2110_vm11 = vcmp.ge.s32.totalorder %v2794_v37, 2576980378  ;;  %3027 = vrcp.f32 %v4873_v11  ;;  %v1603_v41 = vmul.f32 %v4875_v62, %v4820_v22  ;;  %v1760_v53 = vsel %vm1759_vm10, %v4759_v8, %v1756_v18  ;;  %vm1594_vm7 = vmor %vm1592_vm9, %vm1593_vm8 }
 0x297   : > { %v2158_v46 = vmul.f32 %v3942_v13, %v1886_v49  ;;  %vm1762_vm12 = vcmp.eq.f32.partialorder %v1761_v21, 8.507059e+37  ;;  %vm1998_vm13 = vweird.f32 %v4790_v32  ;;  %v1574_v61 = vsub.f32 1.0, %v1573_v29  ;;  %2805 = vmatmul.msk.f32.gmra.mxu0 %vm4881_vm4, %v2137_v19 }
 0x298   : > { %v1765_v1 = vsel %vm1762_vm12, %v1764_v17, %v1760_v53  ;;  %v2786_v28 = vxor.u32 2147483648, %v2022_v33  ;;  %v2004_v50 = vor.u32 1.1754944e-38, %v2003_v9  ;;  %v1581_v16 = vand.u32 2147483647, %v4799_v57  ;;  %vm1999_vm1 = vmor %vm1997_vm5, %vm1998_vm13 }
 0x299   : > { %v1583_v51 = vand.u32 2147483648, %v4799_v57  ;;  %2826 = vmatmul.msk.f32.gmra.mxu2 %vm2110_vm11, %v2158_v46  ;;  %v1766_v13 = vmul.f32 1.1111112, %v1765_v1  ;;  %v1575_v14 = vmul.f32 %v3026_v4, %v1574_v61  ;;  %vm1578_vm14 = vweird.f32 %v3026_v4 }
 0x29a   : > { %vm4905_vm15 = vcmp.ge.s32.totalorder %v2786_v28, 2576980378  ;;  %v1996_v34 = vadd.f32 %v4790_v32, %v1995_v2  ;;  %v1604_v54 = vsub.f32 1.0, %v1603_v41  ;;  %vm1577_vm2 = vweird.f32 %v4799_v57  ;;  %v2012_v2 = vld [vmem:[%s4094_s17 + $0x28] sm:$0xff]  ;;  %v2013_v41 = vld [vmem:[%s4094_s17 + $0x30] sm:$0xff] }
 0x29b   : > { %v2150_v7 = vmul.f32 %v3992_v39, %v1766_v13  ;;  %v2802_v15 = vxor.u32 2147483648, %v2038_v24  ;;  %vm2002_vm3 = vcmp.eq.f32.partialorder %v2001_v44, 8.507059e+37  ;;  %v1576_v30 = vadd.f32 %v3026_v4, %v1575_v14  ;;  %vm1579_vm5 = vmor %vm1577_vm2, %vm1578_vm14 }
 0x29c   : > { %v4917_v5 = vpop.eup %3027  ;;  %v2000_v21 = vsel %vm1999_vm1, %v4790_v32, %v1996_v34  ;;  %v1591_v40 = vadd.f32 %v4772_v27, %v1590_v59  ;;  %v1598_v56 = vand.u32 2147483648, %v4717_v20  ;;  %v1584_v48 = vor.u32 1.1754944e-38, %v1583_v51 }
 0x29d   : > { %2818 = vmatmul.msk.f32.gmra.mxu1 %vm4905_vm15, %v2150_v7  ;;  %v2005_v39 = vsel %vm2002_vm3, %v2004_v50, %v2000_v21  ;;  %v2774_v57 = vxor.u32 2147483648, %v2010_v35  ;;  %v1596_v31 = vand.u32 2147483647, %v4717_v20  ;;  %v1580_v32 = vsel %vm1579_vm5, %v3026_v4, %v1576_v30  ;;  %v2011_v20 = vld [vmem:[%s4094_s17 + $0x20] sm:$0xff]  ;;  %v2014_v21 = vld [vmem:[%s4094_s17 + $0x38] sm:$0xff]  ;;  %s4974_s17 = scalar_lea.vmem [#allocation4], %s2672_s12 }
 0x29e   : > { %v2006_v0 = vmul.f32 1.1111112, %v2005_v39  ;;  %vm1582_vm6 = vcmp.eq.f32.partialorder %v1581_v16, 8.507059e+37  ;;  %v1605_v63 = vmul.f32 %v4875_v62, %v1604_v54  ;;  %vm2134_vm4 = vcmp.ge.s32.totalorder %v2802_v15, 2576980378  ;;  %s2509_s24 = sshll.u32 %s4974_s17, 4  ;;  %s2510_s24 = int_to_ptr.vmem [resolvable:$true] %s2509_s24 }
 0x29f   : > { %v1585_v44 = vsel %vm1582_vm6, %v1584_v48, %v1580_v32  ;;  %v1618_v43 = vmul.f32 %v4917_v5, %v4873_v11  ;;  %v1595_v45 = vsel %vm1594_vm7, %v4772_v27, %v1591_v40  ;;  %v1599_v60 = vor.u32 1.1754944e-38, %v1598_v56 }
 0x2a0   : > { %v2166_v10 = vmul.f32 %v3981_v52, %v2006_v0  ;;  %v1586_v36 = vmul.f32 1.1111112, %v1585_v44  ;;  %vm2050_vm10 = vcmp.ge.s32.totalorder %v2774_v57, 2576980378  ;;  %vm1597_vm11 = vcmp.eq.f32.partialorder %v1596_v31, 8.507059e+37 }
 0x2a1   : > { %v1600_v47 = vsel %vm1597_vm11, %v1599_v60, %v1595_v45  ;;  %vm1608_vm8 = vweird.f32 %v4875_v62  ;;  %v1619_v37 = vsub.f32 1.0, %v1618_v43  ;;  %v1606_v55 = vadd.f32 %v4875_v62, %v1605_v63 }
 0x2a2   : > { %2834 = vmatmul.msk.f32.gmra.mxu3 %vm2134_vm4, %v2166_v10  ;;  %v2138_v9 = vmul.f32 %v4026_v42, %v1586_v36  ;;  %v1613_v52 = vand.u32 2147483648, %v4820_v22  ;;  %v2775_v3 = vxor.u32 2147483648, %v2011_v20  ;;  %vm1607_vm9 = vweird.f32 %v4820_v22 }
 0x2a3   : > { %v1611_v27 = vand.u32 2147483647, %v4820_v22  ;;  %v1601_v59 = vmul.f32 1.1111112, %v1600_v47  ;;  %vm1609_vm12 = vmor %vm1607_vm9, %vm1608_vm8  ;;  %v1620_v42 = vmul.f32 %v4917_v5, %v1619_v37  ;;  %vm1623_vm15 = vweird.f32 %v4917_v5 }
 0x2a4   : > { %2806 = vmatmul.msk.f32.gmra.mxu0 %vm2050_vm10, %v2138_v9  ;;  %v1610_v17 = vsel %vm1609_vm12, %v4875_v62, %v1606_v55  ;;  %v1614_v6 = vor.u32 1.1754944e-38, %v1613_v52  ;;  %vm2053_vm13 = vcmp.ge.s32.totalorder %v2775_v3, 2576980378  ;;  %v1628_v49 = vand.u32 2147483648, %v4873_v11 }
 0x2a5   : > { %v2139_v4 = vmul.f32 %v3979_v23, %v1601_v59  ;;  %vm1612_vm14 = vcmp.eq.f32.partialorder %v1611_v27, 8.507059e+37  ;;  %v1621_v22 = vadd.f32 %v4917_v5, %v1620_v42  ;;  %v2776_v62 = vxor.u32 2147483648, %v2012_v2 }
 0x2a6   : > { %v1615_v25 = vsel %vm1612_vm14, %v1614_v6, %v1610_v17  ;;  %vm1622_vm1 = vweird.f32 %v4873_v11  ;;  %v1626_v18 = vand.u32 2147483647, %v4873_v11  ;;  %v1629_v29 = vor.u32 1.1754944e-38, %v1628_v49 }
 0x2a7   : > { %v1616_v23 = vmul.f32 1.1111112, %v1615_v25  ;;  %vm1624_vm2 = vmor %vm1622_vm1, %vm1623_vm15  ;;  %vm2056_vm3 = vcmp.ge.s32.totalorder %v2776_v62, 2576980378  ;;  %v2777_v53 = vxor.u32 2147483648, %v2013_v41  ;;  %v2778_v48 = vxor.u32 2147483648, %v2014_v21 }
 0x2a8   : > { %v1625_v33 = vsel %vm1624_vm2, %v4917_v5, %v1621_v22  ;;  %vm1627_vm5 = vcmp.eq.f32.partialorder %v1626_v18, 8.507059e+37  ;;  %vm2403_vm9 = vcmask 523520   ;;  %vm2444_vm12 = vcmask 785920  }
 0x2a9   : > { %v2140_v19 = vmul.f32 %v4034_v12, %v1616_v23  ;;  %v1630_v46 = vsel %vm1627_vm5, %v1629_v29, %v1625_v33  ;;  %vm2059_vm6 = vcmp.ge.s32.totalorder %v2777_v53, 2576980378  ;;  %vm2062_vm8 = vcmp.ge.s32.totalorder %v2778_v48, 2576980378 }
 0x2aa   : > { %v2257_v26 = vpop.f32.mrf.mxu1  ;;  %v1631_v61 = vmul.f32 1.1111112, %v1630_v46 }
 0x2ab   : > { %2379 = vrot.lane.b32.xlu1 %v2257_v26, %s3111_s9 }
 0x2ac   : > { %2807 = vmatmul.msk.f32.gmra.mxu0 %vm2053_vm13, %v2139_v4  ;;  %v2141_v11 = vmul.f32 %v4065_v58, %v1631_v61  ;;  %vm2485_vm13 = vcmask 1048320  }
 0x2b4   : > { %2808 = vmatmul.msk.f32.gmra.mxu0 %vm2056_vm3, %v2140_v19 }
 0x2b7   : > { %v2298_v1 = vpop.f32.mrf.mxu2 }
 0x2b8   : > { %2420 = vrot.lane.b32.xlu0 %v2298_v1, %s3112_s10 }
 0x2bc   : > { %2809 = vmatmul.msk.f32.gmra.mxu0 %vm2059_vm6, %v2141_v11 }
 0x2bf   : > { %v2339_v28 = vpop.f32.mrf.mxu3 }
 0x2c0   : > { %2461 = vrot.lane.b32.xlu1 %v2339_v28, %s3113_s11 }
 0x2c1   : > { %v2260_v24 = vpop.f32.mrf.mxu1 }
 0x2c2   : > { %2381 = vrot.lane.b32.xlu2 %v2260_v24, %s3111_s9 }
 0x2c7   : > { %v2342_v16 = vpop.f32.mrf.mxu3 }
 0x2ca   : > { %v2263_v12 = vpop.f32.mrf.mxu1 }
 0x2cb   : > { %2383 = vrot.lane.b32.xlu0 %v2263_v12, %s3111_s9 }
 0x2cf   : > { %v2301_v50 = vpop.f32.mrf.mxu2 }
 0x2d0   : > { %2422 = vrot.lane.b32.xlu2 %v2301_v50, %s3112_s10 }
 0x2d2   : > { %v2266_v51 = vpop.f32.mrf.mxu1 }
 0x2d3   : > { %2463 = vrot.lane.b32.xlu0 %v2342_v16, %s3113_s11 }
 0x2d7   : > { %v2304_v13 = vpop.f32.mrf.mxu2  ;;  %v1478_v58 = vpop.xlane.xlu0 %1477 }
 0x2d8   : > { %2385 = vrot.lane.b32.xlu2 %v2266_v51, %s3111_s9  ;;  %2424 = vrot.lane.b32.xlu1 %v2304_v13, %s3112_s10  ;;  %3029 = vrcp.f32 %v1478_v58  ;;  %v1643_v54 = vand.u32 2147483648, %v1478_v58  ;;  %v1641_v5 = vand.u32 2147483647, %v1478_v58  ;;  %vm1637_vm4 = vweird.f32 %v1478_v58 }
 0x2da   : > { %v2345_v8 = vpop.f32.mrf.mxu3  ;;  %v1644_v56 = vor.u32 1.1754944e-38, %v1643_v54  ;;  %vm1642_vm11 = vcmp.eq.f32.partialorder %v1641_v5, 8.507059e+37 }
 0x2de   : > { %v3030_v14 = vpop.eup %3029 }
 0x2df   : > { %v1633_v34 = vmul.f32 %v3030_v14, %v1478_v58  ;;  %vm1638_vm7 = vweird.f32 %v3030_v14 }
 0x2e0   : > { %2465 = vrot.lane.b32.xlu2 %v2345_v8, %s3113_s11  ;;  %vm1639_vm10 = vmor %vm1637_vm4, %vm1638_vm7 }
 0x2e1   : > { %v1634_v35 = vsub.f32 1.0, %v1633_v34  ;;  %v2307_v7 = vpop.f32.mrf.mxu2 }
 0x2e2   : > { %2426 = vrot.lane.b32.xlu0 %v2307_v7, %s3112_s10  ;;  %v2348_v32 = vpop.f32.mrf.mxu3 }
 0x2e3   : > { %v1635_v15 = vmul.f32 %v3030_v14, %v1634_v35  ;;  %v2269_v30 = vpop.f32.mrf.mxu1 }
 0x2e4   : > { %2387 = vrot.lane.b32.xlu1 %v2269_v30, %s3111_s9 }
 0x2e5   : > { %v1636_v40 = vadd.f32 %v3030_v14, %v1635_v15 }
 0x2e7   : > { %v1640_v39 = vsel %vm1639_vm10, %v3030_v14, %v1636_v40 }
 0x2e8   : > { %v1645_v57 = vsel %vm1642_vm11, %v1644_v56, %v1640_v39 }
 0x2e9   : > { %v1646_v31 = vmul.f32 1.1111112, %v1645_v57 }
 0x2eb   : > { %v2142_v0 = vmul.f32 %v4532_v38, %v1646_v31 }
 0x2ec   : > { %2467 = vrot.lane.b32.xlu1 %v2348_v32, %s3113_s11 }
 0x2ed   : > { %2810 = vmatmul.msk.f32.gmra.mxu0 %vm2062_vm8, %v2142_v0 }
 0x2ef   : > { %v2310_v63 = vpop.f32.mrf.mxu2  ;;  %v2216_v44 = vpop.f32.mrf.mxu0 }
 0x2f0   : > { %2428 = vrot.lane.b32.xlu2 %v2310_v63, %s3112_s10  ;;  %2363 = vst.msk [vmem:[%s4974_s17] sm:$0xff] %vm850_vm0, %v2216_v44  ;;  %v2351_v10 = vpop.f32.mrf.mxu3 }
 0x2f3   : > { %v2272_v43 = vpop.f32.mrf.mxu1 }
 0x2f4   : > { %2389 = vrot.lane.b32.xlu0 %v2272_v43, %s3111_s9 }
 0x2fc   : > { %2469 = vrot.lane.b32.xlu0 %v2351_v10, %s3113_s11 }
 0x302   : > { %v2313_v38 = vpop.f32.mrf.mxu2 }
 0x303   : > { %2430 = vrot.lane.b32.xlu1 %v2313_v38, %s3112_s10 }
 0x305   : > { %v2354_v60 = vpop.f32.mrf.mxu3 }
 0x307   : > { %v2219_v36 = vpop.f32.mrf.mxu0 }
 0x308   : > { %2364 = vst.msk [vmem:[%s4974_s17 + $0x8] sm:$0xff] %vm850_vm0, %v2219_v36 }
 0x309   : > { %v2275_v45 = vpop.f32.mrf.mxu1 }
 0x30a   : > { %2391 = vrot.lane.b32.xlu2 %v2275_v45, %s3111_s9 }
 0x312   : > { %v2316_v9 = vpop.f32.mrf.mxu2 }
 0x313   : > { %2432 = vrot.lane.b32.xlu0 %v2316_v9, %s3112_s10 }
 0x314   : > { %v2222_v20 = vpop.f32.mrf.mxu0  ;;  %v2357_v52 = vpop.f32.mrf.mxu3 }
 0x315   : > { %2365 = vst.msk [vmem:[%s4974_s17 + $0x10] sm:$0xff] %vm850_vm0, %v2222_v20 }
 0x31a   : > { %v2278_v47 = vpop.f32.mrf.mxu1 }
 0x31b   : > { %2393 = vrot.lane.b32.xlu1 %v2278_v47, %s3111_s9 }
 0x31c   : > { %v2319_v37 = vpop.f32.mrf.mxu2  ;;  %v2382_v3 = vpop.permute.xlu2 %2381 }
 0x31d   : > { %v2380_v55 = vpop.permute.xlu1 %2379  ;;  %2434 = vrot.lane.b32.xlu2 %v2319_v37, %s3112_s10  ;;  %2405 = vst.msk [vmem:[%s4974_s17 + $0x8] sm:$0xff] %vm2403_vm9, %v2382_v3  ;;  %s3051_s10 = scalar_lea.hbm %s5094_s5, 128 }
 0x31e   : > { %2404 = vst.msk [vmem:[%s4974_s17] sm:$0xff] %vm2403_vm9, %v2380_v55  ;;  %p3053_p6 = scmp.lt.s32.totalorder %s3051_s10, %s3047_s30 }
 0x320   : > { %p3054_p7 = por %p3053_p6, %p3052_p4 }
 0x321   : > { %v2225_v27 = vpop.f32.mrf.mxu0 }
 0x322   : > { %2366 = vst.msk [vmem:[%s4974_s17 + $0x18] sm:$0xff] %vm850_vm0, %v2225_v27  ;;  %p3055_p8 = pnand %p3054_p7, %p3050_p3 }
 0x323   : > { %2473 = vrot.lane.b32.xlu1 %v2357_v52, %s3113_s11 }
 0x325   : > { %v2360_v59 = vpop.f32.mrf.mxu3  ;;  %2471 = vrot.lane.b32.xlu2 %v2354_v60, %s3113_s11 }
 0x326   : > { %2475 = vrot.lane.b32.xlu0 %v2360_v59, %s3113_s11 }
 0x329   : > { %v2228_v42 = vpop.f32.mrf.mxu0 }
 0x32a   : > { %2367 = vst.msk [vmem:[%s4974_s17 + $0x20] sm:$0xff] %vm850_vm0, %v2228_v42  ;;  %v2421_v17 = vpop.permute.xlu0 %2420  ;;  %v2423_v6 = vpop.permute.xlu2 %2422 }
 0x32b   : > { %2445 = vst.msk [vmem:[%s4974_s17] sm:$0xff] %vm2444_vm12, %v2421_v17 }
 0x32c   : > { %2446 = vst.msk [vmem:[%s4974_s17 + $0x8] sm:$0xff] %vm2444_vm12, %v2423_v6 }
 0x331   : > { %v2231_v26 = vpop.f32.mrf.mxu0 }
 0x332   : > { %2368 = vst.msk [vmem:[%s4974_s17 + $0x28] sm:$0xff] %vm850_vm0, %v2231_v26  ;;  %v2462_v4 = vpop.permute.xlu1 %2461  ;;  %v2386_v2 = vpop.permute.xlu2 %2385 }
 0x333   : > { %2486 = vst.msk [vmem:[%s4974_s17] sm:$0xff] %vm2485_vm13, %v2462_v4 }
 0x334   : > { %2407 = vst.msk [vmem:[%s4974_s17 + $0x18] sm:$0xff] %vm2403_vm9, %v2386_v2 }
 0x339   : > { %v2234_v25 = vpop.f32.mrf.mxu0 }
 0x33a   : > { %2369 = vst.msk [vmem:[%s4974_s17 + $0x30] sm:$0xff] %vm850_vm0, %v2234_v25  ;;  %v2466_v18 = vpop.permute.xlu2 %2465 }
 0x33d   : > { %v2384_v22 = vpop.permute.xlu0 %2383 }
 0x33e   : > { %2406 = vst.msk [vmem:[%s4974_s17 + $0x10] sm:$0xff] %vm2403_vm9, %v2384_v22 }
 0x345   : > { %v2464_v49 = vpop.permute.xlu0 %2463 }
 0x346   : > { %2487 = vst.msk [vmem:[%s4974_s17 + $0x8] sm:$0xff] %vm2485_vm13, %v2464_v49 }
 0x34a   : > { %v2425_v62 = vpop.permute.xlu1 %2424  ;;  %v2429_v29 = vpop.permute.xlu2 %2428 }
 0x34b   : > { %2447 = vst.msk [vmem:[%s4974_s17 + $0x10] sm:$0xff] %vm2444_vm12, %v2425_v62 }
 0x34c   : > { %2488 = vst.msk [vmem:[%s4974_s17 + $0x10] sm:$0xff] %vm2485_vm13, %v2466_v18 }
 0x354   : > { %v2427_v23 = vpop.permute.xlu0 %2426 }
 0x355   : > { %2448 = vst.msk [vmem:[%s4974_s17 + $0x18] sm:$0xff] %vm2444_vm12, %v2427_v23 }
 0x356   : > { %v2388_v33 = vpop.permute.xlu1 %2387 }
 0x357   : > { %2408 = vst.msk [vmem:[%s4974_s17 + $0x20] sm:$0xff] %vm2403_vm9, %v2388_v33 }
 0x358   : > { %2449 = vst.msk [vmem:[%s4974_s17 + $0x20] sm:$0xff] %vm2444_vm12, %v2429_v29 }
 0x35e   : > { %v2468_v19 = vpop.permute.xlu1 %2467 }
 0x35f   : > { %2489 = vst.msk [vmem:[%s4974_s17 + $0x18] sm:$0xff] %vm2485_vm13, %v2468_v19 }
 0x364   : > { %v2392_v41 = vpop.permute.xlu2 %2391 }
 0x365   : > { %2410 = vst.msk [vmem:[%s4974_s17 + $0x30] sm:$0xff] %vm2403_vm9, %v2392_v41 }
 0x366   : > { %v2390_v46 = vpop.permute.xlu0 %2389 }
 0x367   : > { %2409 = vst.msk [vmem:[%s4974_s17 + $0x28] sm:$0xff] %vm2403_vm9, %v2390_v46 }
 0x36a   : > { %v2237_v53 = vpop.f32.mrf.mxu0 }
 0x36b   : > { %2370 = vst.msk [vmem:[%s4974_s17 + $0x38] sm:$0xff] %vm850_vm0, %v2237_v53 }
 0x36e   : > { %v2470_v61 = vpop.permute.xlu0 %2469 }
 0x36f   : > { %2490 = vst.msk [vmem:[%s4974_s17 + $0x20] sm:$0xff] %vm2485_vm13, %v2470_v61 }
 0x375   : > { %v2431_v11 = vpop.permute.xlu1 %2430 }
 0x376   : > { %2450 = vst.msk [vmem:[%s4974_s17 + $0x28] sm:$0xff] %vm2444_vm12, %v2431_v11 }
 0x377   : > { %v2435_v1 = vpop.permute.xlu2 %2434 }
 0x37f   : > { %v2472_v28 = vpop.permute.xlu2 %2471 }
 0x380   : > { %2491 = vst.msk [vmem:[%s4974_s17 + $0x28] sm:$0xff] %vm2485_vm13, %v2472_v28 }
 0x385   : > { %v2433_v24 = vpop.permute.xlu0 %2432 }
 0x386   : > { %2451 = vst.msk [vmem:[%s4974_s17 + $0x30] sm:$0xff] %vm2444_vm12, %v2433_v24 }
 0x38d   : > { %v2394_v12 = vpop.permute.xlu1 %2393 }
 0x38e   : > { %2411 = vst.msk [vmem:[%s4974_s17 + $0x38] sm:$0xff] %vm2403_vm9, %v2394_v12 }
 0x38f   : > { %2452 = vst.msk [vmem:[%s4974_s17 + $0x38] sm:$0xff] %vm2444_vm12, %v2435_v1 }
 0x395   : > { %v2474_v50 = vpop.permute.xlu1 %2473 }
 0x396   : > { %2492 = vst.msk [vmem:[%s4974_s17 + $0x30] sm:$0xff] %vm2485_vm13, %v2474_v50 }
 0x398   : > { %v2476_v16 = vpop.permute.xlu0 %2475 }
 0x399   : > { %2493 = vst.msk [vmem:[%s4974_s17 + $0x38] sm:$0xff] %vm2485_vm13, %v2476_v16 }
 0x39a   : > { %3058 = shalt.err (!%p3055_p8)
}
 0x39b   : > { %s3114_s28 = smov 128   ;;  %s3115_s17 = smov 8  }
 0x39c   : > { %2843 = dma.vmem_to_hbm [thread:$0]  (%p3189_p5), %s2510_s24, 1024, %s2512_s25, %s2495_s21, %s3114_s28, %s3114_s28, %s3115_s17  }
 0x39d PF: > { %s2526_s13 = sand.u32 1, %s3089_s18   ;;  %p2846_p11 = pnand %p2662_p10, %p3200_p9 }
 0x39e   : > { %s2527_s14 = scalar_lea.sflag [#allocation5], %s2526_s13 }
 0x39f   : > { %p2847_p12 = pneg %p2846_p11 }
 0x3a1   : > { %3084 = dma.done.wait (%p2847_p12), %s2527_s14, 1024  }
 0x3a2   : > { %3086 = vsyncadd (%p2847_p12), %s2527_s14, 4294966272  ;;  %s18_s23 = sadd.s32 1, %s3109_s23   ;;  %s5176_s18 = smov %s3093_s19 }
 0x3a3   : > { %p15_p13 = scmp.ge.s32.totalorder %s18_s23, 4   ;;  %s5177_s19 = smov %s3097_s20 }
 0x3a4   : > { %s5178_s20 = smov %s3198_s6  ;;  %s5179_s21 = smov %s3105_s22 }
 0x3a5   : > { %s5180_s22 = smov %s5182_s26  ;;  %17 = sbr.rel (!%p15_p13) target bundleno = 4 (0x4), region = 173 }
 0x3aa   :  { %2533 = vsyncpa [#allocation5], 1 }
 0x3ab   :  { %2535 = vsyncpa [#allocation5 + $0x1], 1 }

</bundles_post_ra>
